<compile_context>
chip_gen: v7x
topology: tpu7x:2x2x1
jax: 0.10.0
libtpu: 0.0.40
codegen_flags: <defaults>
</compile_context>

<pallas_src>
import math

import jax
import jax.numpy as jnp
from jax import lax
from jax.experimental import pallas as pl
from jax.experimental.pallas import tpu as pltpu

D = 128  # embedding_dim (module default)


# --------------------------------------------------------------------------------------
# RETAINLayer kernel: fused alpha/beta GRU recurrence + attention + context, whole batch.
# --------------------------------------------------------------------------------------
def retain_layer_kernel(maxlen_ref,                    # SMEM (1,) int32: max(lengths)
                        lens_ref,                      # VMEM (Bp, 1) int32: per-row lengths
                        rx_ref,                        # VMEM (T*Bp, D): time-major reversed input
                        wih_ref, bih_ref,              # (D, 6D), (1, 6D)   fused input weights
                        whh_ref, bhh_ref,              # (2D, 6D), (1, 6D)  fused block-diag hidden weights
                        wali_ref, bali_ref,            # (1, D), (1, 1)     alpha_li
                        wbli_ref, bbli_ref,            # (D, D), (1, D)     beta_li (transposed)
                        out_ref,                       # (Bp, D) context vectors
                        gi_sc):                        # VMEM scratch (T*Bp, 6D)
    Bp = lens_ref.shape[0]
    TBp, d = rx_ref.shape
    T = TBp // Bp

    # Hoisted input-to-hidden projections for both GRUs: one big MXU matmul before the loop.
    gi_sc[...] = (jnp.dot(rx_ref[...], wih_ref[...], preferred_element_type=jnp.float32)
                  + bih_ref[...])

    # Small loop-invariants only (a handful of vregs); big matrices stay in VMEM refs.
    lens = lens_ref[...]                  # (Bp, 1) int32
    b_ali = bali_ref[...]                 # (1, 1)
    w_ali = wali_ref[...]                 # (1, D)
    b_hh = bhh_ref[...]                   # (1, 6D)
    b_bli = bbli_ref[...]                 # (1, D)
    maxlen = maxlen_ref[0]

    def body(t, carry):
        h, m, l, acc = carry                                   # (Bp,2D) (Bp,1) (Bp,1) (Bp,D)
        row = pl.multiple_of(t * Bp, Bp)
        gi = gi_sc[pl.ds(row, Bp), :]                          # (Bp, 6D) precomputed x-projection
        rx_t = rx_ref[pl.ds(row, Bp), :]                       # (Bp, D)

        # Both GRUs' hidden matmuls fused into one block-diagonal (2D, 6D) dot.
        gh = jnp.dot(h, whh_ref[...], preferred_element_type=jnp.float32) + b_hh

        # Gate layout along the 6D axis: [r_a r_b | z_a z_b | n_a n_b]  (each block D wide).
        r = jax.nn.sigmoid(gi[:, : 2 * d] + gh[:, : 2 * d])
        z = jax.nn.sigmoid(gi[:, 2 * d: 4 * d] + gh[:, 2 * d: 4 * d])
        n = jnp.tanh(gi[:, 4 * d:] + r * gh[:, 4 * d:])
        h_new = (1.0 - z) * n + z * h                          # [h_a | h_b]
        h_a = h_new[:, :d]
        h_b = h_new[:, d:]

        # alpha logit (Linear D->1).  pad_packed_sequence semantics: padded steps see g = 0,
        # so their logit is exactly the bias b_ali.
        logit = jnp.sum(h_a * w_ali, axis=1, keepdims=True) + b_ali       # (Bp, 1)
        logit = jnp.where(t < lens, logit, b_ali)

        # beta attention (Linear D->D, tanh).  No mask needed: rx_t == 0 at padded steps,
        # so those steps contribute nothing to the context anyway.
        beta = jnp.tanh(jnp.dot(h_b, wbli_ref[...], preferred_element_type=jnp.float32)
                        + b_bli)                                          # (Bp, D)

        # Online softmax-weighted accumulation of c = sum_t alpha_t * beta_t * rx_t.
        m_new = jnp.maximum(m, logit)
        scale = jnp.exp(m - m_new)
        p = jnp.exp(logit - m_new)
        l_new = scale * l + p
        acc_new = scale * acc + p * (beta * rx_t)
        return h_new, m_new, l_new, acc_new

    h0 = jnp.zeros((Bp, 2 * d), jnp.float32)
    m0 = jnp.full((Bp, 1), -1e30, jnp.float32)
    l0 = jnp.zeros((Bp, 1), jnp.float32)
    a0 = jnp.zeros((Bp, d), jnp.float32)
    _, m_f, l_f, acc_f = lax.fori_loop(0, maxlen, body, (h0, m0, l0, a0))

    # Steps t in [maxlen, T) (only possible if trailing visits embed to exactly zero):
    # g = 0 there, so each contributes exp(b_ali - m) to the softmax denominator and 0 to c.
    n_tail = (jnp.full((Bp, 1), T, jnp.int32) - maxlen).astype(jnp.float32)
    l_f = l_f + n_tail * jnp.exp(b_ali - m_f)

    out_ref[...] = acc_f * pl.reciprocal(l_f, approx=True)


def fuse_retain_params(p, d):
    """Build fused/pre-transposed kernel weights from PyTorch-shaped RETAINLayer params."""
    zeros = jnp.zeros((d, d), jnp.float32)
    wih_cols, bih_cols, bhh_cols, whh_blocks = [], [], [], []
    for g in range(3):                       # PyTorch GRU gate order: r, z, n
        for name in ("a", "b"):              # alpha GRU, beta GRU
            wih = p["wih_" + name]           # (3D, D)
            whh = p["whh_" + name]           # (3D, D)
            blk_ih = wih[g * d:(g + 1) * d, :].T        # (D, D)
            blk_hh = whh[g * d:(g + 1) * d, :].T        # (D, D)
            wih_cols.append(blk_ih)
            bih_cols.append(p["bih_" + name][g * d:(g + 1) * d])
            bhh_cols.append(p["bhh_" + name][g * d:(g + 1) * d])
            if name == "a":
                whh_blocks.append(jnp.concatenate([blk_hh, zeros], axis=0))   # rows: [h_a | h_b]
            else:
                whh_blocks.append(jnp.concatenate([zeros, blk_hh], axis=0))
    W_ih = jnp.concatenate(wih_cols, axis=1)            # (D, 6D)
    b_ih = jnp.concatenate(bih_cols)[None, :]           # (1, 6D)
    W_hh = jnp.concatenate(whh_blocks, axis=1)          # (2D, 6D) block-diagonal
    b_hh = jnp.concatenate(bhh_cols)[None, :]           # (1, 6D)
    w_ali = p["w_ali"]                                  # (1, D)
    b_ali = p["b_ali"].reshape(1, 1)                    # (1, 1)
    W_bli = p["w_bli"].T                                # (D, D)
    b_bli = p["b_bli"][None, :]                         # (1, D)
    return W_ih, b_ih, W_hh, b_hh, w_ali, b_ali, W_bli, b_bli


def retain_layer(x, mask, params):
    """x: (B, T, D) f32; mask: (B, T) bool; returns context (B, D)."""
    B, T, d = x.shape
    lengths = jnp.sum(mask.astype(jnp.int32), axis=1)                    # (B,)

    # RETAINLayer.reverse_x: reverse only the valid prefix of each sequence (JAX glue).
    t_idx = jnp.arange(T)[None, :]
    Lb = lengths[:, None]
    rev_idx = jnp.where(t_idx < Lb, Lb - 1 - t_idx, t_idx)               # (B, T)
    rx = jnp.take_along_axis(x, jnp.broadcast_to(rev_idx[:, :, None], x.shape), axis=1)

    # Pad the batch to a multiple of 8 sublanes so all in-loop slices are aligned.
    Bp = ((B + 7) // 8) * 8
    rx_p = jnp.pad(rx, ((0, Bp - B), (0, 0), (0, 0)))
    lens_p = jnp.pad(lengths, (0, Bp - B))
    rx_flat = jnp.transpose(rx_p, (1, 0, 2)).reshape(T * Bp, d)          # row index = t*Bp + b
    lens_col = lens_p.reshape(Bp, 1).astype(jnp.int32)
    maxlen = jnp.max(lengths).astype(jnp.int32).reshape(1)

    fused = fuse_retain_params(params, d)

    vmem = pl.BlockSpec(memory_space=pltpu.MemorySpace.VMEM)
    smem = pl.BlockSpec(memory_space=pltpu.MemorySpace.SMEM)
    out = pl.pallas_call(
        retain_layer_kernel,
        out_shape=jax.ShapeDtypeStruct((Bp, d), jnp.float32),
        in_specs=[smem, vmem, vmem,                      # maxlen, lens, rx
                  vmem, vmem, vmem, vmem,                # W_ih, b_ih, W_hh, b_hh
                  vmem, vmem, vmem, vmem],               # w_ali, b_ali, W_bli, b_bli
        out_specs=vmem,
        scratch_shapes=[pltpu.VMEM((T * Bp, 6 * d), jnp.float32)],
    )(maxlen, lens_col, rx_flat, *fused)
    return out[:B]


# --------------------------------------------------------------------------------------
# Final fully-connected layer (lane-dense: output padded to 128 lanes inside the kernel).
# --------------------------------------------------------------------------------------
def fc_kernel(x_ref, w_ref, b_ref, o_ref):
    o_ref[...] = (jnp.dot(x_ref[...], w_ref[...], preferred_element_type=jnp.float32)
                  + b_ref[...])


def fc(x, w, b, output_size):
    """x: (B, F); w: (output_size, F) PyTorch layout; b: (output_size,) -> (B, output_size)."""
    B, F = x.shape
    Op = ((output_size + 127) // 128) * 128
    w_pad = jnp.zeros((F, Op), jnp.float32).at[:, :output_size].set(w.T)
    b_pad = jnp.zeros((1, Op), jnp.float32).at[:, :output_size].set(b.reshape(1, -1))
    out = pl.pallas_call(
        fc_kernel,
        out_shape=jax.ShapeDtypeStruct((B, Op), jnp.float32),
    )(x, w_pad, b_pad)
    return out[:, :output_size]


# --------------------------------------------------------------------------------------
# Parameter init (PyTorch-native shapes, deterministic).
# --------------------------------------------------------------------------------------
def init_retain_params(key, d):
    k = 1.0 / math.sqrt(d)
    keys = jax.random.split(key, 12)
    u = lambda kk, shape: jax.random.uniform(kk, shape, jnp.float32, -k, k)
    return dict(
        wih_a=u(keys[0], (3 * d, d)), whh_a=u(keys[1], (3 * d, d)),
        bih_a=u(keys[2], (3 * d,)), bhh_a=u(keys[3], (3 * d,)),
        wih_b=u(keys[4], (3 * d, d)), whh_b=u(keys[5], (3 * d, d)),
        bih_b=u(keys[6], (3 * d,)), bhh_b=u(keys[7], (3 * d,)),
        w_ali=u(keys[8], (1, d)), b_ali=u(keys[9], (1,)),
        w_bli=u(keys[10], (d, d)), b_bli=u(keys[11], (d,)),
    )


if __name__ == "__main__":
    key = jax.random.PRNGKey(0)
    B, T, C = 2, 8, 4          # batch, visits (seq), codes per visit
    d = D                      # embedding_dim = 128
    output_size = 10
    pad_idx = 0
    # The PyTorch module drops the first tokenizer key; we directly define the kept keys.
    feature_keys = ["conditions", "procedures"]
    vocab_sizes = {"conditions": 64, "procedures": 48}
    # TODO(synk): tokenizer.batch_encode_3d (string -> id) and the nn.Embedding gather have no
    # clean Pallas equivalent; tokens are synthesized and the embedding lookup is JAX glue.

    keys = jax.random.split(key, 8)
    # valid visits are a contiguous prefix; one batch element uses the full length
    lengths_true = jnp.array([6, 8], dtype=jnp.int32)

    patient_emb = []
    for fi, fk in enumerate(feature_keys):
        V = vocab_sizes[fk]
        tok_key, emb_key, par_key = jax.random.split(keys[fi], 3)

        tokens = jax.random.randint(tok_key, (B, T, C), 1, V)          # valid codes (never pad)
        visit_valid = jnp.arange(T)[None, :] < lengths_true[:, None]
        tokens = jnp.where(visit_valid[:, :, None], tokens, pad_idx)   # padded visits -> pad_idx

        emb_table = jax.random.uniform(emb_key, (V, d), jnp.float32, -0.1, 0.1)
        emb_table = emb_table.at[pad_idx].set(0.0)                     # nn.Embedding padding_idx

        x = emb_table[tokens].sum(axis=2)                              # (B, T, D)  sum over codes
        mask = jnp.sum(x, axis=2) != 0                                 # (B, T)

        params = init_retain_params(par_key, d)
        c = retain_layer(x, mask, params)                              # (B, D)
        patient_emb.append(c)

    patient_emb = jnp.concatenate(patient_emb, axis=1)                 # (B, n_feat * D)

    F = patient_emb.shape[1]
    k_fc = 1.0 / math.sqrt(F)
    kw, kb = jax.random.split(keys[7], 2)
    w_fc = jax.random.uniform(kw, (output_size, F), jnp.float32, -k_fc, k_fc)
    b_fc = jax.random.uniform(kb, (output_size,), jnp.float32, -k_fc, k_fc)

    logits = fc(patient_emb, w_fc, b_fc, output_size)                  # (B, output_size)
    jax.block_until_ready(logits)
    assert logits.shape == (B, output_size)
    print("KERNEL_OK")
</pallas_src>

<mosaic_0001>
module attributes {stable_mosaic.version = 11 : i64} {
  func.func @retain_layer_kernel(%arg0: memref<1xi32, #tpu.memory_space<smem>>, %arg1: memref<8x1xi32, #tpu.memory_space<vmem>>, %arg2: memref<64x128xf32, #tpu.memory_space<vmem>>, %arg3: memref<128x768xf32, #tpu.memory_space<vmem>>, %arg4: memref<1x768xf32, #tpu.memory_space<vmem>>, %arg5: memref<256x768xf32, #tpu.memory_space<vmem>>, %arg6: memref<1x768xf32, #tpu.memory_space<vmem>>, %arg7: memref<1x128xf32, #tpu.memory_space<vmem>>, %arg8: memref<1x1xf32, #tpu.memory_space<vmem>>, %arg9: memref<128x128xf32, #tpu.memory_space<vmem>>, %arg10: memref<1x128xf32, #tpu.memory_space<vmem>>, %arg11: memref<8x128xf32, #tpu.memory_space<vmem>>, %arg12: memref<64x768xf32, #tpu.memory_space<vmem>>) attributes {dimension_semantics = [], scalar_prefetch = 0 : i64, scratch_operands = 1 : i64, tpu.core_type = #tpu.core_type<tc>} {
    %c0 = arith.constant 0 : index
    %c0_0 = arith.constant 0 : index
    %0 = vector.load %arg2[%c0, %c0_0] : memref<64x128xf32, #tpu.memory_space<vmem>>, vector<64x128xf32>
    %c0_1 = arith.constant 0 : index
    %c0_2 = arith.constant 0 : index
    %1 = vector.load %arg3[%c0_1, %c0_2] : memref<128x768xf32, #tpu.memory_space<vmem>>, vector<128x768xf32>
    %cst = arith.constant dense<0.000000e+00> : vector<64x768xf32>
    %2 = tpu.matmul %0, %1, %cst {dimension_numbers = #tpu.dot_dimension_numbers<[1], [0], [0], [1], [0, 0, 1, 1], [], []>} : vector<64x128xf32>, vector<128x768xf32>, vector<64x768xf32> -> vector<64x768xf32>
    %c0_3 = arith.constant 0 : index
    %c0_4 = arith.constant 0 : index
    %3 = vector.load %arg4[%c0_3, %c0_4] : memref<1x768xf32, #tpu.memory_space<vmem>>, vector<1x768xf32>
    %4 = vector.broadcast %3 : vector<1x768xf32> to vector<64x768xf32>
    %5 = arith.addf %2, %4 : vector<64x768xf32>
    %c0_5 = arith.constant 0 : index
    %c0_6 = arith.constant 0 : index
    %6 = vector.load %arg12[%c0_5, %c0_6] : memref<64x768xf32, #tpu.memory_space<vmem>>, vector<64x768xf32>
    tpu.vector_store %arg12[%c0_5, %c0_6], %5 {strides = array<i32>} : memref<64x768xf32, #tpu.memory_space<vmem>>, vector<64x768xf32>,
    %c0_7 = arith.constant 0 : index
    %c0_8 = arith.constant 0 : index
    %7 = vector.load %arg1[%c0_7, %c0_8] : memref<8x1xi32, #tpu.memory_space<vmem>>, vector<8x1xi32>
    %c0_9 = arith.constant 0 : index
    %c0_10 = arith.constant 0 : index
    %8 = vector.load %arg8[%c0_9, %c0_10] : memref<1x1xf32, #tpu.memory_space<vmem>>, vector<1x1xf32>
    %c0_11 = arith.constant 0 : index
    %c0_12 = arith.constant 0 : index
    %9 = vector.load %arg7[%c0_11, %c0_12] : memref<1x128xf32, #tpu.memory_space<vmem>>, vector<1x128xf32>
    %c0_13 = arith.constant 0 : index
    %c0_14 = arith.constant 0 : index
    %10 = vector.load %arg6[%c0_13, %c0_14] : memref<1x768xf32, #tpu.memory_space<vmem>>, vector<1x768xf32>
    %c0_15 = arith.constant 0 : index
    %c0_16 = arith.constant 0 : index
    %11 = vector.load %arg10[%c0_15, %c0_16] : memref<1x128xf32, #tpu.memory_space<vmem>>, vector<1x128xf32>
    %c0_17 = arith.constant 0 : index
    %12 = memref.load %arg0[%c0_17] : memref<1xi32, #tpu.memory_space<smem>>
    %cst_18 = arith.constant 0.000000e+00 : f32
    %13 = vector.broadcast %cst_18 : f32 to vector<8x256xf32>
    %cst_19 = arith.constant -1.000000e+30 : f32
    %14 = vector.broadcast %cst_19 : f32 to vector<8x1xf32>
    %cst_20 = arith.constant 0.000000e+00 : f32
    %15 = vector.broadcast %cst_20 : f32 to vector<8x1xf32>
    %cst_21 = arith.constant 0.000000e+00 : f32
    %16 = vector.broadcast %cst_21 : f32 to vector<8x128xf32>
    %c0_i32 = arith.constant 0 : i32
    %17 = arith.subi %12, %c0_i32 : i32
    %18 = arith.addi %c0_i32, %17 : i32
    %c1_i32 = arith.constant 1 : i32
    %19:4 = scf.for %arg13 = %c0_i32 to %18 step %c1_i32 iter_args(%arg14 = %13, %arg15 = %14, %arg16 = %15, %arg17 = %16) -> (vector<8x256xf32>, vector<8x1xf32>, vector<8x1xf32>, vector<8x128xf32>)  : i32 {
      %c8_i32_24 = arith.constant 8 : i32
      %33 = arith.muli %arg13, %c8_i32_24 : i32
      %34 = tpu.assume_multiple %33, 8 : i32
      %35 = arith.index_cast %34 : i32 to index
      %c0_25 = arith.constant 0 : index
      %36 = vector.load %arg12[%35, %c0_25] : memref<64x768xf32, #tpu.memory_space<vmem>>, vector<8x768xf32>
      %37 = arith.index_cast %34 : i32 to index
      %c0_26 = arith.constant 0 : index
      %38 = vector.load %arg2[%37, %c0_26] : memref<64x128xf32, #tpu.memory_space<vmem>>, vector<8x128xf32>
      %c0_27 = arith.constant 0 : index
      %c0_28 = arith.constant 0 : index
      %39 = vector.load %arg5[%c0_27, %c0_28] : memref<256x768xf32, #tpu.memory_space<vmem>>, vector<256x768xf32>
      %cst_29 = arith.constant dense<0.000000e+00> : vector<8x768xf32>
      %40 = tpu.matmul %arg14, %39, %cst_29 {dimension_numbers = #tpu.dot_dimension_numbers<[1], [0], [0], [1], [0, 0, 1, 1], [], []>} : vector<8x256xf32>, vector<256x768xf32>, vector<8x768xf32> -> vector<8x768xf32>
      %41 = vector.broadcast %10 : vector<1x768xf32> to vector<8x768xf32>
      %42 = arith.addf %40, %41 : vector<8x768xf32>
      %43 = vector.extract_strided_slice %36 {offsets = [0, 0], sizes = [8, 256], strides = [1, 1]} : vector<8x768xf32> to vector<8x256xf32>
      %44 = vector.extract_strided_slice %42 {offsets = [0, 0], sizes = [8, 256], strides = [1, 1]} : vector<8x768xf32> to vector<8x256xf32>
      %45 = arith.addf %43, %44 : vector<8x256xf32>
      %46 = arith.negf %45 : vector<8x256xf32>
      %47 = math.exp %46 : vector<8x256xf32>
      %cst_30 = arith.constant 1.000000e+00 : f32
      %48 = vector.broadcast %cst_30 : f32 to vector<8x256xf32>
      %49 = arith.addf %48, %47 : vector<8x256xf32>
      %50 = arith.divf %48, %49 : vector<8x256xf32>
      %51 = vector.extract_strided_slice %36 {offsets = [0, 256], sizes = [8, 256], strides = [1, 1]} : vector<8x768xf32> to vector<8x256xf32>
      %52 = vector.extract_strided_slice %42 {offsets = [0, 256], sizes = [8, 256], strides = [1, 1]} : vector<8x768xf32> to vector<8x256xf32>
      %53 = arith.addf %51, %52 : vector<8x256xf32>
      %54 = arith.negf %53 : vector<8x256xf32>
      %55 = math.exp %54 : vector<8x256xf32>
      %cst_31 = arith.constant 1.000000e+00 : f32
      %56 = vector.broadcast %cst_31 : f32 to vector<8x256xf32>
      %57 = arith.addf %56, %55 : vector<8x256xf32>
      %58 = arith.divf %56, %57 : vector<8x256xf32>
      %59 = vector.extract_strided_slice %36 {offsets = [0, 512], sizes = [8, 256], strides = [1, 1]} : vector<8x768xf32> to vector<8x256xf32>
      %60 = vector.extract_strided_slice %42 {offsets = [0, 512], sizes = [8, 256], strides = [1, 1]} : vector<8x768xf32> to vector<8x256xf32>
      %61 = arith.mulf %50, %60 : vector<8x256xf32>
      %62 = arith.addf %59, %61 : vector<8x256xf32>
      %63 = math.tanh %62 : vector<8x256xf32>
      %cst_32 = arith.constant 1.000000e+00 : f32
      %64 = vector.broadcast %cst_32 : f32 to vector<8x256xf32>
      %65 = arith.subf %64, %58 : vector<8x256xf32>
      %66 = arith.mulf %65, %63 : vector<8x256xf32>
      %67 = arith.mulf %58, %arg14 : vector<8x256xf32>
      %68 = arith.addf %66, %67 : vector<8x256xf32>
      %69 = vector.extract_strided_slice %68 {offsets = [0, 0], sizes = [8, 128], strides = [1, 1]} : vector<8x256xf32> to vector<8x128xf32>
      %70 = vector.extract_strided_slice %68 {offsets = [0, 128], sizes = [8, 128], strides = [1, 1]} : vector<8x256xf32> to vector<8x128xf32>
      %71 = vector.broadcast %9 : vector<1x128xf32> to vector<8x128xf32>
      %72 = arith.mulf %69, %71 : vector<8x128xf32>
      %cst_33 = arith.constant dense<0.000000e+00> : vector<8xf32>
      %73 = vector.multi_reduction <add>, %72, %cst_33 [1] : vector<8x128xf32> to vector<8xf32>
      %74 = vector.shape_cast %73 : vector<8xf32> to vector<8x1xf32>
      %75 = vector.broadcast %8 : vector<1x1xf32> to vector<8x1xf32>
      %76 = arith.addf %74, %75 : vector<8x1xf32>
      %77 = vector.broadcast %arg13 : i32 to vector<8x1xi32>
      %78 = arith.cmpi slt, %77, %7 : vector<8x1xi32>
      %79 = vector.shape_cast %8 : vector<1x1xf32> to vector<1x1xf32>
      %80 = vector.broadcast %79 : vector<1x1xf32> to vector<8x1xf32>
      %81 = arith.select %78, %76, %80 : vector<8x1xi1>, vector<8x1xf32>
      %c0_34 = arith.constant 0 : index
      %c0_35 = arith.constant 0 : index
      %82 = vector.load %arg9[%c0_34, %c0_35] : memref<128x128xf32, #tpu.memory_space<vmem>>, vector<128x128xf32>
      %cst_36 = arith.constant dense<0.000000e+00> : vector<8x128xf32>
      %83 = tpu.matmul %70, %82, %cst_36 {dimension_numbers = #tpu.dot_dimension_numbers<[1], [0], [0], [1], [0, 0, 1, 1], [], []>} : vector<8x128xf32>, vector<128x128xf32>, vector<8x128xf32> -> vector<8x128xf32>
      %84 = vector.broadcast %11 : vector<1x128xf32> to vector<8x128xf32>
      %85 = arith.addf %83, %84 : vector<8x128xf32>
      %86 = math.tanh %85 : vector<8x128xf32>
      %87 = arith.maximumf %arg15, %81 : vector<8x1xf32>
      %88 = arith.subf %arg15, %87 : vector<8x1xf32>
      %89 = math.exp %88 : vector<8x1xf32>
      %90 = arith.subf %81, %87 : vector<8x1xf32>
      %91 = math.exp %90 : vector<8x1xf32>
      %92 = arith.mulf %89, %arg16 : vector<8x1xf32>
      %93 = arith.addf %92, %91 : vector<8x1xf32>
      %94 = vector.broadcast %89 : vector<8x1xf32> to vector<8x128xf32>
      %95 = arith.mulf %94, %arg17 : vector<8x128xf32>
      %96 = arith.mulf %86, %38 : vector<8x128xf32>
      %97 = vector.broadcast %91 : vector<8x1xf32> to vector<8x128xf32>
      %98 = arith.mulf %97, %96 : vector<8x128xf32>
      %99 = arith.addf %95, %98 : vector<8x128xf32>
      scf.yield %68, %87, %93, %99 : vector<8x256xf32>, vector<8x1xf32>, vector<8x1xf32>, vector<8x128xf32>
    }
    %c8_i32 = arith.constant 8 : i32
    %20 = vector.broadcast %c8_i32 : i32 to vector<8x1xi32>
    %21 = vector.broadcast %12 : i32 to vector<8x1xi32>
    %22 = arith.subi %20, %21 : vector<8x1xi32>
    %23 = arith.sitofp %22 : vector<8x1xi32> to vector<8x1xf32>
    %24 = vector.broadcast %8 : vector<1x1xf32> to vector<8x1xf32>
    %25 = arith.subf %24, %19#1 : vector<8x1xf32>
    %26 = math.exp %25 : vector<8x1xf32>
    %27 = arith.mulf %23, %26 : vector<8x1xf32>
    %28 = arith.addf %19#2, %27 : vector<8x1xf32>
    %29 = tpu.reciprocal %28 {approx = true} : vector<8x1xf32> -> vector<8x1xf32>
    %30 = vector.broadcast %29 : vector<8x1xf32> to vector<8x128xf32>
    %31 = arith.mulf %19#3, %30 : vector<8x128xf32>
    %c0_22 = arith.constant 0 : index
    %c0_23 = arith.constant 0 : index
    %32 = vector.load %arg11[%c0_22, %c0_23] : memref<8x128xf32, #tpu.memory_space<vmem>>, vector<8x128xf32>
    tpu.vector_store %arg11[%c0_22, %c0_23], %31 {strides = array<i32>} : memref<8x128xf32, #tpu.memory_space<vmem>>, vector<8x128xf32>,
    return
  }
}

</mosaic_0001>

<bundles_post_ra>
// kernel: tpu_custom_call.1
= control target key start
LH: loop header
LB: loop body
LE: loop exit
PB: predicated region body
PF: predicated region fallthrough
CT: control target
= control target key end

     0   :  { %s2439_s0 = inlined_call_operand.<no memory space> [shape: s32[1], index: 0, kind: input, shape index: {}]   ;;  %s2440_s1 = inlined_call_operand.vmem [shape: s32[8,1], index: 1, kind: input, shape index: {}]   ;;  %s2441_s2 = inlined_call_operand.hbm [shape: f32[64,128], index: 2, kind: input, shape index: {}]   ;;  %s2442_s3 = inlined_call_operand.hbm [shape: f32[128,768], index: 3, kind: input, shape index: {}]   ;;  %s2443_s4 = inlined_call_operand.vmem [shape: f32[1,768], index: 4, kind: input, shape index: {}]   ;;  %s2444_s5 = inlined_call_operand.hbm [shape: f32[256,768], index: 5, kind: input, shape index: {}]   ;;  %s2445_s6 = inlined_call_operand.vmem [shape: f32[1,768], index: 6, kind: input, shape index: {}]   ;;  %s2446_s7 = inlined_call_operand.vmem [shape: f32[1,128], index: 7, kind: input, shape index: {}]   ;;  %s2447_s8 = inlined_call_operand.<no memory space> [shape: f32[1,1], index: 8, kind: input, shape index: {}]   ;;  %s2448_s9 = inlined_call_operand.hbm [shape: f32[128,128], index: 9, kind: input, shape index: {}]   ;;  %s2449_s10 = inlined_call_operand.vmem [shape: f32[1,128], index: 10, kind: input, shape index: {}]   ;;  %s2450_s11 = inlined_call_operand.hbm [shape: f32[8,128], index: 11, kind: output, shape index: {}]  }
   0x1   :  { %v17_v0 = vstv %s2447_s8 }
   0x2   :  { %18 = vst [vmem:[#allocation4] sm:$0x1] %v17_v0 }
   0x3   :  { %19 = vsyncpa [#allocation6], 0 }
   0x4   :  { %20 = vsyncpa [#allocation9], 0 }
   0x5   :  { %21 = vsyncpa [#allocation12], 0 }
   0x6   :  { %22 = vsyncpa [#allocation7], 0  ;;  %s2027_s19 = smov [#allocation8]   ;;  %s1837_s23 = scalar_lea.hbm %s2442_s3, 12288 }
   0x7   :  { %s44_s20 = sshll.u32 %s2027_s19, 4  ;;  %p1838_p0 = scmp.ne.s32.totalorder %s2442_s3, %s1837_s23  ;;  %s45_s20 = int_to_ptr.vmem [resolvable:$true] %s44_s20 }
   0x8   :  { %p1841_p1 = scmp.lt.u32.totalorder %s1837_s23, %s2442_s3 }
   0xa   :  { %p1843_p2 = pnand %p1841_p1, %p1838_p0 }
   0xc   :  { %1846 = shalt.err (!%p1843_p2)
}
   0xd   :  { %s1847_s8 = scalar_lea.vmem %s45_s20, 12288  ;;  %p1852_p4 = scmp.lt.s32.totalorder %s45_s20, %s45_s20 }
   0xe   :  { %p1848_p3 = scmp.ne.s32.totalorder %s45_s20, %s1847_s8  ;;  %p1853_p5 = scmp.lt.s32.totalorder %s1847_s8, %s1847_s8 }
  0x10   :  { %p1854_p6 = por %p1853_p5, %p1852_p4 }
  0x12   :  { %p1855_p7 = pnand %p1854_p6, %p1848_p3 }
  0x14   :  { %1858 = shalt.err (!%p1855_p7)
}
  0x15   :  { %s2028_s28 = smov 768   ;;  %s2029_s29 = smov 48  }
  0x16   :  { %50 = dma.hbm_to_vmem [thread:$0]  %s2442_s3, 12288, %s45_s20, [#allocation9], %s2028_s28, %s2028_s28, %s2029_s29  }
  0x17   :  { %s2030_s13 = smov [#allocation5]   ;;  %s1859_s17 = scalar_lea.hbm %s2441_s2, 1024 }
  0x18   :  { %s32_s14 = sshll.u32 %s2030_s13, 4  ;;  %p1860_p8 = scmp.ne.s32.totalorder %s2441_s2, %s1859_s17  ;;  %s33_s14 = int_to_ptr.vmem [resolvable:$true] %s32_s14 }
  0x19   :  { %p1863_p9 = scmp.lt.u32.totalorder %s1859_s17, %s2441_s2 }
  0x1b   :  { %p1865_p10 = pnand %p1863_p9, %p1860_p8 }
  0x1d   :  { %1868 = shalt.err (!%p1865_p10)
}
  0x1e   :  { %s1869_s23 = scalar_lea.vmem %s33_s14, 1024  ;;  %p1874_p12 = scmp.lt.s32.totalorder %s33_s14, %s33_s14 }
  0x1f   :  { %p1870_p11 = scmp.ne.s32.totalorder %s33_s14, %s1869_s23  ;;  %p1875_p13 = scmp.lt.s32.totalorder %s1869_s23, %s1869_s23 }
  0x21   :  { %p1876_p0 = por %p1875_p13, %p1874_p12 }
  0x23   :  { %p1877_p1 = pnand %p1876_p0, %p1870_p11 }
  0x25   :  { %1880 = shalt.err (!%p1877_p1)
}
  0x26   :  { %s2031_s3 = smov 128   ;;  %s2032_s20 = smov 8  }
  0x27   :  { %38 = dma.hbm_to_vmem [thread:$0]  %s2441_s2, 1024, %s33_s14, [#allocation6], %s2031_s3, %s2031_s3, %s2032_s20  }
  0x28   :  { %s2033_s26 = smov [#allocation10]   ;;  %s2034_s8 = smov [#allocation11]  }
  0x29   :  { %s58_s27 = sshll.u32 %s2033_s26, 4  ;;  %s76_s30 = sshll.u32 %s2034_s8, 4  ;;  %s59_s27 = int_to_ptr.vmem [resolvable:$true] %s58_s27  ;;  %s2135_s30 = int_to_ptr.vmem [resolvable:$true] %s76_s30 }
  0x2a   :  { %s1881_s15 = scalar_lea.hbm %s2444_s5, 24576 }
  0x2b   :  { %p1882_p2 = scmp.ne.s32.totalorder %s2444_s5, %s1881_s15  ;;  %p1885_p3 = scmp.lt.u32.totalorder %s1881_s15, %s2444_s5 }
  0x2d   :  { %p1887_p4 = pnand %p1885_p3, %p1882_p2 }
  0x2f   :  { %1890 = shalt.err (!%p1887_p4)
}
  0x30   :  { %s1891_s2 = scalar_lea.vmem %s59_s27, 24576  ;;  %p1896_p6 = scmp.lt.s32.totalorder %s59_s27, %s59_s27 }
  0x31   :  { %p1892_p5 = scmp.ne.s32.totalorder %s59_s27, %s1891_s2  ;;  %p1897_p7 = scmp.lt.s32.totalorder %s1891_s2, %s1891_s2 }
  0x33   :  { %p1898_p8 = por %p1897_p7, %p1896_p6 }
  0x35   :  { %p1899_p9 = pnand %p1898_p8, %p1892_p5 }
  0x37   :  { %1902 = shalt.err (!%p1899_p9)
}
  0x38   :  { %64 = dma.hbm_to_vmem [thread:$0]  %s2444_s5, 24576, %s59_s27, [#allocation9], %s2028_s28, %s2028_s28, %s2029_s29  }
  0x39   :  { %s1903_s24 = scalar_lea.hbm %s2448_s9, 2048 }
  0x3a   :  { %p1904_p10 = scmp.ne.s32.totalorder %s2448_s9, %s1903_s24  ;;  %p1907_p11 = scmp.lt.u32.totalorder %s1903_s24, %s2448_s9 }
  0x3c   :  { %p1909_p12 = pnand %p1907_p11, %p1904_p10 }
  0x3e   :  { %1912 = shalt.err (!%p1909_p12)
}
  0x3f   :  { %s1913_s13 = scalar_lea.vmem %s2135_s30, 2048  ;;  %p1918_p0 = scmp.lt.s32.totalorder %s2135_s30, %s2135_s30 }
  0x40   :  { %p1914_p13 = scmp.ne.s32.totalorder %s2135_s30, %s1913_s13  ;;  %p1919_p1 = scmp.lt.s32.totalorder %s1913_s13, %s1913_s13 }
  0x42   :  { %p1920_p2 = por %p1919_p1, %p1918_p0 }
  0x44   :  { %p1921_p3 = pnand %p1920_p2, %p1914_p13 }
  0x46   :  { %1924 = shalt.err (!%p1921_p3)
}
  0x47   :  { %82 = dma.hbm_to_vmem [thread:$0]  %s2448_s9, 2048, %s2135_s30, [#allocation12], %s2031_s3, %s2031_s3, %s2032_s20  }
  0x48   :  { %1983 = dma.done.wait [#allocation6], 1024  }
  0x49   :  { %1984 = vsyncadd [#allocation6], 4294966272 }
  0x4a   :  { %1985 = dma.done.wait [#allocation9], 36864  }
  0x4b   :  { %1986 = vsyncadd [#allocation9], 4294930432 }
  0x4c   :  { %1987 = dma.done.wait [#allocation12], 2048  }
  0x4d   :  { %1988 = vsyncadd [#allocation12], 4294965248  ;;  %v2035_v1 = vmov 0.0   ;;  %v2177_v2 = vld [vmem:[%s2440_s1] sm:$0xff]  ;;  %v106_v7 = vld [vmem:[#allocation8 + $0x8] sm:$0xff]  ;;  %p1327_p4 = scmp.le.s32.totalorder %s2439_s0, 0 }
  0x4e   :  { %297 = vmatprep.mubr.f32.mxu0 %v2035_v1  ;;  %410 = vmatprep.mubr.f32.mxu1 %v2035_v1  ;;  %v2179_v3 = vld [vmem:[#allocation4] sm:$0x1]  ;;  %v114_v10 = vld [vmem:[#allocation8 + $0x48] sm:$0xff]  ;;  %v105_v13 = vld [vmem:[#allocation8] sm:$0xff] }
  0x4f   :  { %v2184_v4 = vld [vmem:[%s2446_s7] ss:$0 sm:$0xff]  ;;  %v111_v14 = vld [vmem:[#allocation8 + $0x30] sm:$0xff]  ;;  %v113_v17 = vld [vmem:[#allocation8 + $0x40] sm:$0xff] }
  0x50   :  { %v2189_v5 = vld [vmem:[%s2445_s6] sm:$0x3f]  ;;  %v107_v15 = vld [vmem:[#allocation8 + $0x10] sm:$0xff]  ;;  %v1391_v16 = vpack.c.bf16 %v111_v14, %v105_v13  ;;  %v118_v18 = vld [vmem:[#allocation8 + $0x68] sm:$0xff] }
  0x51   :  { %v2194_v6 = vld [vmem:[%s2449_s10] ss:$0 sm:$0xff]  ;;  %v1423_v20 = vpack.c.bf16 %v113_v17, %v107_v15  ;;  %v126_v23 = vld [vmem:[#allocation8 + $0xa8] sm:$0xff]  ;;  %v117_v24 = vld [vmem:[#allocation8 + $0x60] sm:$0xff]  ;;  %s2329_s10 = smov (!%p1327_p4), 0  }
  0x52   :  { %v112_v8 = vld [vmem:[#allocation8 + $0x38] sm:$0xff]  ;;  %v123_v26 = vld [vmem:[#allocation8 + $0x90] sm:$0xff]  ;;  %v125_v28 = vld [vmem:[#allocation8 + $0xa0] sm:$0xff] }
  0x53   :  { %v108_v9 = vld [vmem:[#allocation8 + $0x18] sm:$0xff]  ;;  %v1389_v11 = vpack.c.bf16 %v112_v8, %v106_v7  ;;  %v119_v27 = vld [vmem:[#allocation8 + $0x70] sm:$0xff]  ;;  %v1395_v29 = vpack.c.bf16 %v123_v26, %v117_v24  ;;  %v130_v31 = vld [vmem:[#allocation8 + $0xc8] sm:$0xff] }
  0x54   :  { %v1421_v12 = vpack.c.bf16 %v114_v10, %v108_v9  ;;  %v124_v19 = vld [vmem:[#allocation8 + $0x98] sm:$0xff]  ;;  %v1427_v30 = vpack.c.bf16 %v125_v28, %v119_v27  ;;  %v138_v35 = vld [vmem:[#allocation8 + $0x108] sm:$0xff]  ;;  %v129_v36 = vld [vmem:[#allocation8 + $0xc0] sm:$0xff] }
  0x55   :  { %1390 = vmatprep.subr.bf16.mxu0 %v1389_v11  ;;  %v1393_v21 = vpack.c.bf16 %v124_v19, %v118_v18  ;;  %v120_v22 = vld [vmem:[#allocation8 + $0x78] sm:$0xff]  ;;  %v135_v37 = vld [vmem:[#allocation8 + $0xf0] sm:$0xff]  ;;  %v137_v40 = vld [vmem:[#allocation8 + $0x100] sm:$0xff] }
  0x56   :  { %1422 = vmatprep.subr.bf16.mxu1 %v1421_v12  ;;  %1392 = vmatpush1.bf16.msra.mxu0 %v1391_v16  ;;  %v1425_v25 = vpack.c.bf16 %v126_v23, %v120_v22  ;;  %v136_v32 = vld [vmem:[#allocation8 + $0xf8] sm:$0xff]  ;;  %v131_v39 = vld [vmem:[#allocation8 + $0xd0] sm:$0xff]  ;;  %v142_v41 = vld [vmem:[#allocation8 + $0x128] sm:$0xff]  ;;  %v1399_v42 = vpack.c.bf16 %v135_v37, %v129_v36 }
  0x57   :  { %1424 = vmatpush1.bf16.msra.mxu1 %v1423_v20  ;;  %1394 = vmatprep.subr.bf16.mxu0 %v1393_v21  ;;  %v132_v33 = vld [vmem:[#allocation8 + $0xd8] sm:$0xff]  ;;  %v1397_v34 = vpack.c.bf16 %v136_v32, %v130_v31  ;;  %v150_v45 = vld [vmem:[#allocation8 + $0x168] sm:$0xff]  ;;  %v1431_v46 = vpack.c.bf16 %v137_v40, %v131_v39  ;;  %v141_v48 = vld [vmem:[#allocation8 + $0x120] sm:$0xff] }
  0x58   :  { %1426 = vmatprep.subr.bf16.mxu1 %v1425_v25  ;;  %v1429_v38 = vpack.c.bf16 %v138_v35, %v132_v33  ;;  %v148_v43 = vld [vmem:[#allocation8 + $0x158] sm:$0xff]  ;;  %v147_v49 = vld [vmem:[#allocation8 + $0x150] sm:$0xff]  ;;  %v149_v52 = vld [vmem:[#allocation8 + $0x160] sm:$0xff] }
  0x59   :  { %v144_v44 = vld [vmem:[#allocation8 + $0x138] sm:$0xff]  ;;  %v1401_v47 = vpack.c.bf16 %v148_v43, %v142_v41  ;;  %v143_v50 = vld [vmem:[#allocation8 + $0x130] sm:$0xff]  ;;  %v154_v53 = vld [vmem:[#allocation8 + $0x188] sm:$0xff]  ;;  %v1403_v57 = vpack.c.bf16 %v147_v49, %v141_v48 }
  0x5a   :  { %1396 = vmatpush1.bf16.msra.mxu0 %v1395_v29  ;;  %v1433_v51 = vpack.c.bf16 %v150_v45, %v144_v44  ;;  %v160_v54 = vld [vmem:[#allocation8 + $0x1b8] sm:$0xff]  ;;  %v162_v56 = vld [vmem:[#allocation8 + $0x1c8] sm:$0xff]  ;;  %v1435_v58 = vpack.c.bf16 %v149_v52, %v143_v50  ;;  %v153_v60 = vld [vmem:[#allocation8 + $0x180] sm:$0xff] }
  0x5b   :  { %1428 = vmatpush1.bf16.msra.mxu1 %v1427_v30  ;;  %1398 = vmatprep.subr.bf16.mxu0 %v1397_v34  ;;  %v156_v55 = vld [vmem:[#allocation8 + $0x198] sm:$0xff]  ;;  %v1405_v59 = vpack.c.bf16 %v160_v54, %v154_v53  ;;  %v159_v61 = vld [vmem:[#allocation8 + $0x1b0] sm:$0xff]  ;;  %v161_v0 = vld [vmem:[#allocation8 + $0x1c0] sm:$0xff] }
  0x5c   :  { %1430 = vmatprep.subr.bf16.mxu1 %v1429_v38  ;;  %v155_v62 = vld [vmem:[#allocation8 + $0x190] sm:$0xff]  ;;  %v1437_v63 = vpack.c.bf16 %v162_v56, %v156_v55  ;;  %v166_v7 = vld [vmem:[#allocation8 + $0x1e8] sm:$0xff]  ;;  %v172_v8 = vld [vmem:[#allocation8 + $0x218] sm:$0xff]  ;;  %v1407_v11 = vpack.c.bf16 %v159_v61, %v153_v60 }
  0x5d   :  { %v168_v9 = vld [vmem:[#allocation8 + $0x1f8] sm:$0xff]  ;;  %v174_v10 = vld [vmem:[#allocation8 + $0x228] sm:$0xff]  ;;  %v1439_v12 = vpack.c.bf16 %v161_v0, %v155_v62  ;;  %v1409_v13 = vpack.c.bf16 %v172_v8, %v166_v7  ;;  %v165_v14 = vld [vmem:[#allocation8 + $0x1e0] sm:$0xff] }
  0x5e   :  { %1400 = vmatpush1.bf16.msra.mxu0 %v1399_v42  ;;  %v171_v15 = vld [vmem:[#allocation8 + $0x210] sm:$0xff]  ;;  %v1441_v17 = vpack.c.bf16 %v174_v10, %v168_v9  ;;  %v173_v18 = vld [vmem:[#allocation8 + $0x220] sm:$0xff]  ;;  %v178_v19 = vld [vmem:[#allocation8 + $0x248] sm:$0xff] }
  0x5f   :  { %1432 = vmatpush1.bf16.msra.mxu1 %v1431_v46  ;;  %1402 = vmatprep.subr.bf16.mxu0 %v1401_v47  ;;  %v167_v16 = vld [vmem:[#allocation8 + $0x1f0] sm:$0xff]  ;;  %v184_v20 = vld [vmem:[#allocation8 + $0x278] sm:$0xff]  ;;  %v186_v22 = vld [vmem:[#allocation8 + $0x288] sm:$0xff]  ;;  %v1411_v23 = vpack.c.bf16 %v171_v15, %v165_v14 }
  0x60   :  { %1434 = vmatprep.subr.bf16.mxu1 %v1433_v51  ;;  %v180_v21 = vld [vmem:[#allocation8 + $0x258] sm:$0xff]  ;;  %v1443_v24 = vpack.c.bf16 %v173_v18, %v167_v16  ;;  %v1413_v25 = vpack.c.bf16 %v184_v20, %v178_v19  ;;  %v177_v26 = vld [vmem:[#allocation8 + $0x240] sm:$0xff]  ;;  %v183_v27 = vld [vmem:[#allocation8 + $0x270] sm:$0xff] }
  0x61   :  { %v179_v28 = vld [vmem:[#allocation8 + $0x250] sm:$0xff]  ;;  %v1445_v29 = vpack.c.bf16 %v186_v22, %v180_v21  ;;  %v185_v30 = vld [vmem:[#allocation8 + $0x280] sm:$0xff]  ;;  %v190_v31 = vld [vmem:[#allocation8 + $0x2a8] sm:$0xff]  ;;  %v1415_v35 = vpack.c.bf16 %v183_v27, %v177_v26 }
  0x62   :  { %1404 = vmatpush1.bf16.msra.mxu0 %v1403_v57  ;;  %v196_v32 = vld [vmem:[#allocation8 + $0x2d8] sm:$0xff]  ;;  %v198_v34 = vld [vmem:[#allocation8 + $0x2e8] sm:$0xff]  ;;  %v1447_v36 = vpack.c.bf16 %v185_v30, %v179_v28  ;;  %v189_v38 = vld [vmem:[#allocation8 + $0x2a0] sm:$0xff] }
  0x63   :  { %1436 = vmatpush1.bf16.msra.mxu1 %v1435_v58  ;;  %1406 = vmatprep.subr.bf16.mxu0 %v1405_v59  ;;  %v192_v33 = vld [vmem:[#allocation8 + $0x2b8] sm:$0xff]  ;;  %v1417_v37 = vpack.c.bf16 %v196_v32, %v190_v31  ;;  %v195_v39 = vld [vmem:[#allocation8 + $0x2d0] sm:$0xff]  ;;  %v197_v42 = vld [vmem:[#allocation8 + $0x2e0] sm:$0xff] }
  0x64   :  { %1438 = vmatprep.subr.bf16.mxu1 %v1437_v63  ;;  %v191_v40 = vld [vmem:[#allocation8 + $0x2b0] sm:$0xff]  ;;  %v1449_v41 = vpack.c.bf16 %v198_v34, %v192_v33  ;;  %v110_v43 = vld [vmem:[#allocation8 + $0x28] sm:$0xff]  ;;  %v116_v44 = vld [vmem:[#allocation8 + $0x58] sm:$0xff]  ;;  %v1419_v45 = vpack.c.bf16 %v195_v39, %v189_v38 }
  0x65   :  { %v1451_v46 = vpack.c.bf16 %v197_v42, %v191_v40  ;;  %v1453_v47 = vpack.c.bf16 %v116_v44, %v110_v43  ;;  %v109_v48 = vld [vmem:[#allocation8 + $0x20] sm:$0xff]  ;;  %v115_v49 = vld [vmem:[#allocation8 + $0x50] sm:$0xff]  ;;  %v122_v50 = vld [vmem:[#allocation8 + $0x88] sm:$0xff]  ;;  %v203_v43 = vlaneseq }
  0x66   :  { %1408 = vmatpush1.bf16.msra.mxu0 %v1407_v11  ;;  %v128_v51 = vld [vmem:[#allocation8 + $0xb8] sm:$0xff]  ;;  %v2196_v52 = vld [vmem:[#allocation5] sm:$0xff]  ;;  %v1455_v53 = vpack.c.bf16 %v115_v49, %v109_v48  ;;  %v127_v55 = vld [vmem:[#allocation8 + $0xb0] sm:$0xff] }
  0x67   :  { %1440 = vmatpush1.bf16.msra.mxu1 %v1439_v12  ;;  %1410 = vmatprep.subr.bf16.mxu0 %v1409_v13  ;;  %v121_v54 = vld [vmem:[#allocation8 + $0x80] sm:$0xff]  ;;  %v1457_v56 = vpack.c.bf16 %v128_v51, %v122_v50  ;;  %v134_v57 = vld [vmem:[#allocation8 + $0xe8] sm:$0xff]  ;;  %v140_v58 = vld [vmem:[#allocation8 + $0x118] sm:$0xff]  ;;  %v2238_v44 = vshrl.u32 %v203_v43, 7 }
  0x68   :  { %1442 = vmatprep.subr.bf16.mxu1 %v1441_v17  ;;  %v2200_v59 = vld [vmem:[#allocation5 + $0x8] sm:$0xff]  ;;  %v1459_v60 = vpack.c.bf16 %v127_v55, %v121_v54  ;;  %v133_v61 = vld [vmem:[#allocation8 + $0xe0] sm:$0xff]  ;;  %v139_v62 = vld [vmem:[#allocation8 + $0x110] sm:$0xff]  ;;  %v1461_v63 = vpack.c.bf16 %v140_v58, %v134_v57 }
  0x69   :  { %v146_v0 = vld [vmem:[#allocation8 + $0x148] sm:$0xff]  ;;  %v152_v7 = vld [vmem:[#allocation8 + $0x178] sm:$0xff]  ;;  %v2206_v8 = vld [vmem:[#allocation5 + $0x10] sm:$0xff]  ;;  %v1463_v9 = vpack.c.bf16 %v139_v62, %v133_v61  ;;  %v209_v48 = vsub.s32 1, %v2238_v44 }
  0x6a   :  { %1412 = vmatpush1.bf16.msra.mxu0 %v1411_v23  ;;  %v145_v10 = vld [vmem:[#allocation8 + $0x140] sm:$0xff]  ;;  %v151_v11 = vld [vmem:[#allocation8 + $0x170] sm:$0xff]  ;;  %v1465_v12 = vpack.c.bf16 %v152_v7, %v146_v0  ;;  %v158_v13 = vld [vmem:[#allocation8 + $0x1a8] sm:$0xff] }
  0x6b   :  { %1444 = vmatpush1.bf16.msra.mxu1 %v1443_v24  ;;  %1414 = vmatprep.subr.bf16.mxu0 %v1413_v25  ;;  %v164_v14 = vld [vmem:[#allocation8 + $0x1d8] sm:$0xff]  ;;  %v1467_v16 = vpack.c.bf16 %v151_v11, %v145_v10  ;;  %v157_v17 = vld [vmem:[#allocation8 + $0x1a0] sm:$0xff]  ;;  %v163_v18 = vld [vmem:[#allocation8 + $0x1d0] sm:$0xff] }
  0x6c   :  { %1446 = vmatprep.subr.bf16.mxu1 %v1445_v29  ;;  %v2212_v15 = vld [vmem:[#allocation5 + $0x18] sm:$0xff]  ;;  %v1469_v19 = vpack.c.bf16 %v164_v14, %v158_v13  ;;  %v170_v20 = vld [vmem:[#allocation8 + $0x208] sm:$0xff]  ;;  %v101_v22 = vld [vmem:[#allocation5 + $0x20] sm:$0xff]  ;;  %v1471_v23 = vpack.c.bf16 %v163_v18, %v157_v17 }
  0x6d   :  { %v176_v21 = vld [vmem:[#allocation8 + $0x238] sm:$0xff]  ;;  %v169_v24 = vld [vmem:[#allocation8 + $0x200] sm:$0xff]  ;;  %v175_v25 = vld [vmem:[#allocation8 + $0x230] sm:$0xff] }
  0x6e   :  { %1416 = vmatpush1.bf16.msra.mxu0 %v1415_v35  ;;  %v1473_v26 = vpack.c.bf16 %v176_v21, %v170_v20  ;;  %v182_v27 = vld [vmem:[#allocation8 + $0x268] sm:$0xff]  ;;  %v188_v28 = vld [vmem:[#allocation8 + $0x298] sm:$0xff]  ;;  %v1475_v30 = vpack.c.bf16 %v175_v25, %v169_v24  ;;  %v181_v31 = vld [vmem:[#allocation8 + $0x260] sm:$0xff] }
  0x6f   :  { %1448 = vmatpush1.bf16.msra.mxu1 %v1447_v36  ;;  %1418 = vmatprep.subr.bf16.mxu0 %v1417_v37  ;;  %v102_v29 = vld [vmem:[#allocation5 + $0x28] sm:$0xff]  ;;  %v187_v32 = vld [vmem:[#allocation8 + $0x290] sm:$0xff]  ;;  %v1477_v33 = vpack.c.bf16 %v188_v28, %v182_v27  ;;  %v200_v35 = vld [vmem:[#allocation8 + $0x2f8] sm:$0xff] }
  0x70   :  { %1450 = vmatprep.subr.bf16.mxu1 %v1449_v41  ;;  %v194_v34 = vld [vmem:[#allocation8 + $0x2c8] sm:$0xff]  ;;  %v103_v36 = vld [vmem:[#allocation5 + $0x30] sm:$0xff]  ;;  %v1479_v37 = vpack.c.bf16 %v187_v32, %v181_v31  ;;  %v193_v38 = vld [vmem:[#allocation8 + $0x2c0] sm:$0xff] }
  0x71   :  { %v199_v39 = vld [vmem:[#allocation8 + $0x2f0] sm:$0xff]  ;;  %v1481_v40 = vpack.c.bf16 %v200_v35, %v194_v34  ;;  %v104_v41 = vld [vmem:[#allocation5 + $0x38] sm:$0xff] }
  0x72   :  { %1420 = vmatpush1.bf16.msra.mxu0 %v1419_v45  ;;  %v1483_v42 = vpack.c.bf16 %v199_v39, %v193_v38  ;;  %v2241_v45 = vsub.s32 0, %v2238_v44 }
  0x73   :  { %1452 = vmatpush1.bf16.msra.mxu1 %v1451_v46  ;;  %1454 = vmatprep.subr.bf16.mxu0 %v1453_v47  ;;  %v2246_v46 = vld [vmem:[%s2443_s4] sm:$0x3f] }
  0x74   :  { %1701 = vmatprep.subr.bf16.mxu1 %v1453_v47  ;;  %v213_v47 = vsub.s32 2, %v2238_v44  ;;  %v2253_v49 = vrot.slane %v2246_v46, %v2241_v45  ;;  %v2263_v51 = vrot.slane %v2246_v46, %v209_v48 }
  0x75   :  { %298 = vmatmul.mubr.f32.vlgmr.msra.gmra.mrb[0].mxu0 %v2196_v52 }
  0x76   :  { %411 = vmatmul.mubr.f32.vlgmr.msra.gmra.mrb[0].mxu1 %v2196_v52  ;;  %1456 = vmatpush1.bf16.msra.mxu0 %v1455_v53  ;;  %v2258_v50 = vrot.slane %v2246_v46, %v213_v47 }
  0x77   :  { %1709 = vmatpush1.bf16.msra.mxu1 %v1455_v53  ;;  %303 = vmatprep.mubr.f32.mxu0 %v2035_v1 }
  0x78   :  { %416 = vmatprep.mubr.f32.mxu1 %v2035_v1  ;;  %1458 = vmatprep.subr.bf16.mxu0 %v1457_v56 }
  0x79   :  { %304 = vmatmul.mubr.f32.gmra.mrb[2].mxu0 %v2200_v59  ;;  %1702 = vmatprep.subr.bf16.mxu1 %v1457_v56 }
  0x7a   :  { %417 = vmatmul.mubr.f32.gmra.mrb[2].mxu1 %v2200_v59  ;;  %1460 = vmatpush1.bf16.msra.mxu0 %v1459_v60 }
  0x7b   :  { %1710 = vmatpush1.bf16.msra.mxu1 %v1459_v60  ;;  %309 = vmatprep.mubr.f32.mxu0 %v2035_v1 }
  0x7c   :  { %422 = vmatprep.mubr.f32.mxu1 %v2035_v1  ;;  %1462 = vmatprep.subr.bf16.mxu0 %v1461_v63 }
  0x7d   :  { %310 = vmatmul.mubr.f32.gmra.mrb[4].mxu0 %v2206_v8  ;;  %1703 = vmatprep.subr.bf16.mxu1 %v1461_v63 }
  0x7e   :  { %423 = vmatmul.mubr.f32.gmra.mrb[4].mxu1 %v2206_v8  ;;  %1464 = vmatpush1.bf16.msra.mxu0 %v1463_v9 }
  0x7f   :  { %1711 = vmatpush1.bf16.msra.mxu1 %v1463_v9  ;;  %315 = vmatprep.mubr.f32.mxu0 %v2035_v1 }
  0x80   :  { %428 = vmatprep.mubr.f32.mxu1 %v2035_v1  ;;  %1466 = vmatprep.subr.bf16.mxu0 %v1465_v12 }
  0x81   :  { %316 = vmatmul.mubr.f32.gmra.mrb[6].mxu0 %v2212_v15  ;;  %1704 = vmatprep.subr.bf16.mxu1 %v1465_v12 }
  0x82   :  { %429 = vmatmul.mubr.f32.gmra.mrb[6].mxu1 %v2212_v15  ;;  %1468 = vmatpush1.bf16.msra.mxu0 %v1467_v16 }
  0x83   :  { %1712 = vmatpush1.bf16.msra.mxu1 %v1467_v16  ;;  %321 = vmatprep.mubr.f32.mxu0 %v2035_v1 }
  0x84   :  { %434 = vmatprep.mubr.f32.mxu1 %v2035_v1  ;;  %1470 = vmatprep.subr.bf16.mxu0 %v1469_v19 }
  0x85   :  { %322 = vmatmul.mubr.f32.gmra.mrb[8].mxu0 %v101_v22  ;;  %1705 = vmatprep.subr.bf16.mxu1 %v1469_v19 }
  0x86   :  { %435 = vmatmul.mubr.f32.gmra.mrb[8].mxu1 %v101_v22  ;;  %1472 = vmatpush1.bf16.msra.mxu0 %v1471_v23 }
  0x87   :  { %1713 = vmatpush1.bf16.msra.mxu1 %v1471_v23  ;;  %327 = vmatprep.mubr.f32.mxu0 %v2035_v1 }
  0x88   :  { %440 = vmatprep.mubr.f32.mxu1 %v2035_v1  ;;  %1474 = vmatprep.subr.bf16.mxu0 %v1473_v26 }
  0x89   :  { %328 = vmatmul.mubr.f32.gmra.mrb[10].mxu0 %v102_v29  ;;  %1706 = vmatprep.subr.bf16.mxu1 %v1473_v26 }
  0x8a   :  { %441 = vmatmul.mubr.f32.gmra.mrb[10].mxu1 %v102_v29  ;;  %1476 = vmatpush1.bf16.msra.mxu0 %v1475_v30 }
  0x8b   :  { %1714 = vmatpush1.bf16.msra.mxu1 %v1475_v30  ;;  %333 = vmatprep.mubr.f32.mxu0 %v2035_v1 }
  0x8c   :  { %446 = vmatprep.mubr.f32.mxu1 %v2035_v1  ;;  %1478 = vmatprep.subr.bf16.mxu0 %v1477_v33 }
  0x8d   :  { %334 = vmatmul.mubr.f32.gmra.mrb[12].mxu0 %v103_v36  ;;  %1707 = vmatprep.subr.bf16.mxu1 %v1477_v33 }
  0x8e   :  { %447 = vmatmul.mubr.f32.gmra.mrb[12].mxu1 %v103_v36  ;;  %1480 = vmatpush1.bf16.msra.mxu0 %v1479_v37 }
  0x8f   :  { %1715 = vmatpush1.bf16.msra.mxu1 %v1479_v37  ;;  %339 = vmatprep.mubr.f32.mxu0 %v2035_v1 }
  0x90   :  { %452 = vmatprep.mubr.f32.mxu1 %v2035_v1  ;;  %1482 = vmatprep.subr.bf16.mxu0 %v1481_v40 }
  0x91   :  { %340 = vmatmul.mubr.f32.gmra.mrb[14].mxu0 %v104_v41  ;;  %1708 = vmatprep.subr.bf16.mxu1 %v1481_v40 }
  0x92   :  { %453 = vmatmul.mubr.f32.gmra.mrb[14].mxu1 %v104_v41  ;;  %1484 = vmatpush1.bf16.msra.mxu0 %v1483_v42 }
  0x93   :  { %1716 = vmatpush1.bf16.msra.mxu1 %v1483_v42  ;;  %523 = vmatprep.mubr.f32.mxu0 %v2035_v1 }
  0x94   :  { %547 = vmatprep.mubr.f32.mxu1 %v2035_v1 }
  0x95   :  { %524 = vmatmul.mubr.f32.vlgmr.msra.gmra.mrb[16].mxu0 %v2196_v52 }
  0x96   :  { %548 = vmatmul.mubr.f32.vlgmr.msra.gmra.mrb[16].mxu1 %v101_v22  ;;  %529 = vmatprep.mubr.f32.mxu0 %v2035_v1 }
  0x97   :  { %553 = vmatprep.mubr.f32.mxu1 %v2035_v1 }
  0x99   :  { %530 = vmatmul.mubr.f32.gmra.mrb[18].mxu0 %v2200_v59 }
  0x9a   :  { %554 = vmatmul.mubr.f32.gmra.mrb[18].mxu1 %v102_v29  ;;  %535 = vmatprep.mubr.f32.mxu0 %v2035_v1 }
  0x9b   :  { %559 = vmatprep.mubr.f32.mxu1 %v2035_v1 }
  0x9d   :  { %536 = vmatmul.mubr.f32.gmra.mrb[20].mxu0 %v2206_v8 }
  0x9e   :  { %560 = vmatmul.mubr.f32.gmra.mrb[20].mxu1 %v103_v36  ;;  %541 = vmatprep.mubr.f32.mxu0 %v2035_v1 }
  0x9f   :  { %565 = vmatprep.mubr.f32.mxu1 %v2035_v1  ;;  %v217_v1 = vsub.s32 3, %v2238_v44 }
  0xa1   :  { %542 = vmatmul.mubr.f32.gmra.mrb[22].mxu0 %v2212_v15  ;;  %v2268_v52 = vrot.slane %v2246_v46, %v217_v1 }
  0xa2   :  { %566 = vmatmul.mubr.f32.gmra.mrb[22].mxu1 %v104_v41 }
 0x148   :  { %v299_v53 = vpop.f32.mrb[0].mxu0 }
 0x149   :  { %v300_v54 = vadd.f32 %v299_v53, %v2253_v49  ;;  %v412_v55 = vpop.f32.mrb[0].mxu1  ;;  %v301_v56 = vpop.f32.mrb[1].mxu0 }
 0x14a   :  { %v413_v57 = vadd.f32 %v412_v55, %v2258_v50  ;;  %v302_v58 = vadd.f32 %v301_v56, %v2263_v51  ;;  %v414_v59 = vpop.f32.mrb[1].mxu1  ;;  %v221_v56 = vsub.s32 4, %v2238_v44 }
 0x14b   :  { %572 = vst [vmem:[#allocation2] sm:$0xff] %v300_v54  ;;  %v415_v60 = vadd.f32 %v414_v59, %v2268_v52 }
 0x14c   :  { %574 = vst [vmem:[#allocation2 + $0x10] sm:$0xff] %v413_v57  ;;  %573 = vst [vmem:[#allocation2 + $0x8] sm:$0xff] %v302_v58  ;;  %v305_v61 = vpop.f32.mrb[2].mxu0 }
 0x14d   :  { %575 = vst [vmem:[#allocation2 + $0x18] sm:$0xff] %v415_v60  ;;  %v306_v62 = vadd.f32 %v305_v61, %v2253_v49  ;;  %v418_v63 = vpop.f32.mrb[2].mxu1  ;;  %v307_v0 = vpop.f32.mrb[3].mxu0  ;;  %v225_v60 = vsub.s32 5, %v2238_v44 }
 0x14e   :  { %v419_v7 = vadd.f32 %v418_v63, %v2258_v50  ;;  %v308_v8 = vadd.f32 %v307_v0, %v2263_v51  ;;  %v420_v9 = vpop.f32.mrb[3].mxu1 }
 0x14f   :  { %578 = vst [vmem:[#allocation2 + $0x30] sm:$0xff] %v306_v62  ;;  %v421_v10 = vadd.f32 %v420_v9, %v2268_v52 }
 0x150   :  { %580 = vst [vmem:[#allocation2 + $0x40] sm:$0xff] %v419_v7  ;;  %579 = vst [vmem:[#allocation2 + $0x38] sm:$0xff] %v308_v8  ;;  %v311_v11 = vpop.f32.mrb[4].mxu0  ;;  %v222_v8 = vrot.slane %v2246_v46, %v221_v56 }
 0x151   :  { %581 = vst [vmem:[#allocation2 + $0x48] sm:$0xff] %v421_v10  ;;  %v312_v12 = vadd.f32 %v311_v11, %v2253_v49  ;;  %v424_v13 = vpop.f32.mrb[4].mxu1  ;;  %v313_v14 = vpop.f32.mrb[5].mxu0 }
 0x152   :  { %v425_v15 = vadd.f32 %v424_v13, %v2258_v50  ;;  %v314_v16 = vadd.f32 %v313_v14, %v2263_v51  ;;  %v426_v17 = vpop.f32.mrb[5].mxu1 }
 0x153   :  { %584 = vst [vmem:[#allocation2 + $0x60] sm:$0xff] %v312_v12  ;;  %v427_v18 = vadd.f32 %v426_v17, %v2268_v52  ;;  %v226_v12 = vrot.slane %v2246_v46, %v225_v60 }
 0x154   :  { %586 = vst [vmem:[#allocation2 + $0x70] sm:$0xff] %v425_v15  ;;  %585 = vst [vmem:[#allocation2 + $0x68] sm:$0xff] %v314_v16  ;;  %v317_v19 = vpop.f32.mrb[6].mxu0 }
 0x155   :  { %587 = vst [vmem:[#allocation2 + $0x78] sm:$0xff] %v427_v18  ;;  %v318_v20 = vadd.f32 %v317_v19, %v2253_v49  ;;  %v430_v21 = vpop.f32.mrb[6].mxu1  ;;  %v319_v22 = vpop.f32.mrb[7].mxu0 }
 0x156   :  { %v431_v23 = vadd.f32 %v430_v21, %v2258_v50  ;;  %v320_v24 = vadd.f32 %v319_v22, %v2263_v51  ;;  %v432_v25 = vpop.f32.mrb[7].mxu1 }
 0x157   :  { %590 = vst [vmem:[#allocation2 + $0x90] sm:$0xff] %v318_v20  ;;  %v433_v26 = vadd.f32 %v432_v25, %v2268_v52 }
 0x158   :  { %592 = vst [vmem:[#allocation2 + $0xa0] sm:$0xff] %v431_v23  ;;  %591 = vst [vmem:[#allocation2 + $0x98] sm:$0xff] %v320_v24  ;;  %v323_v27 = vpop.f32.mrb[8].mxu0 }
 0x159   :  { %593 = vst [vmem:[#allocation2 + $0xa8] sm:$0xff] %v433_v26  ;;  %v324_v28 = vadd.f32 %v323_v27, %v2253_v49  ;;  %v436_v29 = vpop.f32.mrb[8].mxu1  ;;  %v325_v30 = vpop.f32.mrb[9].mxu0 }
 0x15a   :  { %v437_v31 = vadd.f32 %v436_v29, %v2258_v50  ;;  %v326_v32 = vadd.f32 %v325_v30, %v2263_v51  ;;  %v438_v33 = vpop.f32.mrb[9].mxu1 }
 0x15b   :  { %596 = vst [vmem:[#allocation2 + $0xc0] sm:$0xff] %v324_v28  ;;  %v439_v34 = vadd.f32 %v438_v33, %v2268_v52 }
 0x15c   :  { %598 = vst [vmem:[#allocation2 + $0xd0] sm:$0xff] %v437_v31  ;;  %597 = vst [vmem:[#allocation2 + $0xc8] sm:$0xff] %v326_v32  ;;  %v329_v35 = vpop.f32.mrb[10].mxu0 }
 0x15d   :  { %599 = vst [vmem:[#allocation2 + $0xd8] sm:$0xff] %v439_v34  ;;  %v330_v36 = vadd.f32 %v329_v35, %v2253_v49  ;;  %v442_v37 = vpop.f32.mrb[10].mxu1  ;;  %v331_v38 = vpop.f32.mrb[11].mxu0 }
 0x15e   :  { %v443_v39 = vadd.f32 %v442_v37, %v2258_v50  ;;  %v332_v40 = vadd.f32 %v331_v38, %v2263_v51  ;;  %v444_v41 = vpop.f32.mrb[11].mxu1 }
 0x15f   :  { %602 = vst [vmem:[#allocation2 + $0xf0] sm:$0xff] %v330_v36  ;;  %v445_v42 = vadd.f32 %v444_v41, %v2268_v52  ;;  %v2313_v41 = vmov 0.0  }
 0x160   :  { %604 = vst [vmem:[#allocation2 + $0x100] sm:$0xff] %v443_v39  ;;  %603 = vst [vmem:[#allocation2 + $0xf8] sm:$0xff] %v332_v40  ;;  %v335_v43 = vpop.f32.mrb[12].mxu0 }
 0x161   :  { %605 = vst [vmem:[#allocation2 + $0x108] sm:$0xff] %v445_v42  ;;  %v336_v53 = vadd.f32 %v335_v43, %v2253_v49  ;;  %v448_v54 = vpop.f32.mrb[12].mxu1  ;;  %v337_v55 = vpop.f32.mrb[13].mxu0  ;;  %v2315_v42 = vmov 0.0   ;;  %v2317_v43 = vmov -1e+30  }
 0x162   :  { %v449_v57 = vadd.f32 %v448_v54, %v2258_v50  ;;  %v338_v58 = vadd.f32 %v337_v55, %v2263_v51  ;;  %v450_v59 = vpop.f32.mrb[13].mxu1  ;;  %v2321_v54 = vmov (!%p1327_p4), 0.0   ;;  %v2323_v55 = vmov (!%p1327_p4), -1e+30  }
 0x163   :  { %608 = vst [vmem:[#allocation2 + $0x120] sm:$0xff] %v336_v53  ;;  %v451_v61 = vadd.f32 %v450_v59, %v2268_v52  ;;  %v2319_v53 = vmov (!%p1327_p4), 0.0  }
 0x164   :  { %610 = vst [vmem:[#allocation2 + $0x130] sm:$0xff] %v449_v57  ;;  %609 = vst [vmem:[#allocation2 + $0x128] sm:$0xff] %v338_v58  ;;  %v341_v62 = vpop.f32.mrb[14].mxu0  ;;  %v2325_v57 = vmov (!%p1327_p4), 0.0   ;;  %v2327_v58 = vmov (!%p1327_p4), 0.0  }
 0x165   :  { %611 = vst [vmem:[#allocation2 + $0x138] sm:$0xff] %v451_v61  ;;  %v342_v63 = vadd.f32 %v341_v62, %v2253_v49  ;;  %v454_v0 = vpop.f32.mrb[14].mxu1  ;;  %v343_v7 = vpop.f32.mrb[15].mxu0 }
 0x166   :  { %v455_v9 = vadd.f32 %v454_v0, %v2258_v50  ;;  %v344_v10 = vadd.f32 %v343_v7, %v2263_v51  ;;  %v456_v11 = vpop.f32.mrb[15].mxu1 }
 0x167   :  { %614 = vst [vmem:[#allocation2 + $0x150] sm:$0xff] %v342_v63  ;;  %v457_v13 = vadd.f32 %v456_v11, %v2268_v52 }
 0x168   :  { %616 = vst [vmem:[#allocation2 + $0x160] sm:$0xff] %v455_v9  ;;  %615 = vst [vmem:[#allocation2 + $0x158] sm:$0xff] %v344_v10  ;;  %v525_v49 = vpop.f32.mrb[16].mxu0 }
 0x169   :  { %617 = vst [vmem:[#allocation2 + $0x168] sm:$0xff] %v457_v13  ;;  %v526_v14 = vadd.f32 %v525_v49, %v222_v8  ;;  %v549_v15 = vpop.f32.mrb[16].mxu1  ;;  %v527_v16 = vpop.f32.mrb[17].mxu0 }
 0x16a   :  { %v550_v17 = vadd.f32 %v549_v15, %v222_v8  ;;  %v528_v18 = vadd.f32 %v527_v16, %v226_v12  ;;  %v551_v50 = vpop.f32.mrb[17].mxu1 }
 0x16b   :  { %576 = vst [vmem:[#allocation2 + $0x20] sm:$0xff] %v526_v14  ;;  %v552_v51 = vadd.f32 %v551_v50, %v226_v12 }
 0x16c   :  { %600 = vst [vmem:[#allocation2 + $0xe0] sm:$0xff] %v550_v17  ;;  %577 = vst [vmem:[#allocation2 + $0x28] sm:$0xff] %v528_v18  ;;  %v531_v19 = vpop.f32.mrb[18].mxu0 }
 0x16d   :  { %601 = vst [vmem:[#allocation2 + $0xe8] sm:$0xff] %v552_v51  ;;  %v532_v46 = vadd.f32 %v531_v19, %v222_v8  ;;  %v555_v20 = vpop.f32.mrb[18].mxu1  ;;  %v533_v21 = vpop.f32.mrb[19].mxu0 }
 0x16e   :  { %v556_v52 = vadd.f32 %v555_v20, %v222_v8  ;;  %v534_v22 = vadd.f32 %v533_v21, %v226_v12  ;;  %v557_v23 = vpop.f32.mrb[19].mxu1 }
 0x16f   :  { %582 = vst [vmem:[#allocation2 + $0x50] sm:$0xff] %v532_v46  ;;  %v558_v24 = vadd.f32 %v557_v23, %v226_v12 }
 0x170   :  { %606 = vst [vmem:[#allocation2 + $0x110] sm:$0xff] %v556_v52  ;;  %583 = vst [vmem:[#allocation2 + $0x58] sm:$0xff] %v534_v22  ;;  %v537_v25 = vpop.f32.mrb[20].mxu0 }
 0x171   :  { %607 = vst [vmem:[#allocation2 + $0x118] sm:$0xff] %v558_v24  ;;  %v538_v26 = vadd.f32 %v537_v25, %v222_v8  ;;  %v561_v27 = vpop.f32.mrb[20].mxu1  ;;  %v539_v28 = vpop.f32.mrb[21].mxu0 }
 0x172   :  { %v562_v29 = vadd.f32 %v561_v27, %v222_v8  ;;  %v540_v30 = vadd.f32 %v539_v28, %v226_v12  ;;  %v563_v31 = vpop.f32.mrb[21].mxu1 }
 0x173   :  { %588 = vst [vmem:[#allocation2 + $0x80] sm:$0xff] %v538_v26  ;;  %v564_v32 = vadd.f32 %v563_v31, %v226_v12  ;;  %1314 = sbr.rel (%p1327_p4) target bundleno = 1040 (0x410), region = 83 }
 0x174   :  { %612 = vst [vmem:[#allocation2 + $0x140] sm:$0xff] %v562_v29  ;;  %589 = vst [vmem:[#allocation2 + $0x88] sm:$0xff] %v540_v30  ;;  %v543_v33 = vpop.f32.mrb[22].mxu0 }
 0x175   :  { %613 = vst [vmem:[#allocation2 + $0x148] sm:$0xff] %v564_v32  ;;  %v544_v34 = vadd.f32 %v543_v33, %v222_v8  ;;  %v567_v35 = vpop.f32.mrb[22].mxu1  ;;  %v545_v36 = vpop.f32.mrb[23].mxu0 }
 0x176   :  { %v568_v37 = vadd.f32 %v567_v35, %v222_v8  ;;  %v546_v38 = vadd.f32 %v545_v36, %v226_v12  ;;  %v569_v39 = vpop.f32.mrb[23].mxu1 }
 0x177   :  { %594 = vst [vmem:[#allocation2 + $0xb0] sm:$0xff] %v544_v34  ;;  %v570_v40 = vadd.f32 %v569_v39, %v226_v12 }
 0x178   :  { %618 = vst [vmem:[#allocation2 + $0x170] sm:$0xff] %v568_v37  ;;  %595 = vst [vmem:[#allocation2 + $0xb8] sm:$0xff] %v546_v38 }
 0x179   :  { %619 = vst [vmem:[#allocation2 + $0x178] sm:$0xff] %v570_v40 }
 0x17a LB: > { %v652_v59 = vld [vmem:[#allocation10 + $0x8] sm:$0xff]  ;;  %v658_v61 = vld [vmem:[#allocation10 + $0x38] sm:$0xff]  ;;  %v651_v62 = vld [vmem:[#allocation10] sm:$0xff]  ;;  %938 = vmatprep.mubr.f32.mxu0 %v2005_v57  ;;  %1009 = vmatprep.mubr.f32.mxu1 %v2005_v57  ;;  %vm2037_vm0 = vmmov 0   ;;  %s1328_s17 = sshll.u32 %s2013_s10, 3  ;;  %s2013_s10 = sphi %s2329_s10, %s629_s10   ;;  %v2009_v58 = vphi %v2327_v58, %v1127_v58   ;;  %v2005_v57 = vphi %v2325_v57, %v1128_v57   ;;  %v2001_v55 = vphi %v2323_v55, %v2453_v55   ;;  %v1997_v54 = vphi %v2321_v54, %v2452_v54   ;;  %v1993_v53 = vphi %v2319_v53, %v2451_v53  }
 0x17b   : > { %v1485_v63 = vpack.c.bf16 %v658_v61, %v652_v59  ;;  %v657_v0 = vld [vmem:[#allocation10 + $0x30] sm:$0xff]  ;;  %v664_v7 = vld [vmem:[#allocation10 + $0x68] sm:$0xff]  ;;  %v670_v8 = vld [vmem:[#allocation10 + $0x98] sm:$0xff]  ;;  %s638_s18 = sshra.s32 %s1328_s17, 3  ;;  %s649_s14 = scalar_lea.vmem [#allocation5], %s1328_s17 }
 0x17c   : > { %v1487_v9 = vpack.c.bf16 %v657_v0, %v651_v62  ;;  %v1489_v10 = vpack.c.bf16 %v670_v8, %v664_v7  ;;  %v663_v11 = vld [vmem:[#allocation10 + $0x60] sm:$0xff]  ;;  %v669_v12 = vld [vmem:[#allocation10 + $0x90] sm:$0xff]  ;;  %v676_v13 = vld [vmem:[#allocation10 + $0xc8] sm:$0xff]  ;;  %s1336_s19 = smul.u32 48, %s638_s18 }
 0x17d   : > { %1486 = vmatprep.subr.bf16.mxu0 %v1485_v63  ;;  %v682_v49 = vld [vmem:[#allocation10 + $0xf8] sm:$0xff]  ;;  %v1491_v14 = vpack.c.bf16 %v669_v12, %v663_v11  ;;  %v675_v16 = vld [vmem:[#allocation10 + $0xc0] sm:$0xff]  ;;  %v681_v17 = vld [vmem:[#allocation10 + $0xf0] sm:$0xff] }
 0x17e   : > { %1488 = vmatpush1.bf16.msra.mxu0 %v1487_v9  ;;  %v1493_v15 = vpack.c.bf16 %v682_v49, %v676_v13  ;;  %v688_v18 = vld [vmem:[#allocation10 + $0x128] sm:$0xff]  ;;  %v694_v50 = vld [vmem:[#allocation10 + $0x158] sm:$0xff]  ;;  %v1495_v51 = vpack.c.bf16 %v681_v17, %v675_v16  ;;  %v687_v46 = vld [vmem:[#allocation10 + $0x120] sm:$0xff]  ;;  %s2363_s2 = scalar_lea.vmem [#allocation2], %s1336_s19 }
 0x17f   : > { %1490 = vmatprep.subr.bf16.mxu0 %v1489_v10  ;;  %v1497_v19 = vpack.c.bf16 %v694_v50, %v688_v18  ;;  %v693_v20 = vld [vmem:[#allocation10 + $0x150] sm:$0xff]  ;;  %v700_v21 = vld [vmem:[#allocation10 + $0x188] sm:$0xff]  ;;  %v706_v52 = vld [vmem:[#allocation10 + $0x1b8] sm:$0xff] }
 0x180   : > { %v1499_v22 = vpack.c.bf16 %v693_v20, %v687_v46  ;;  %v1501_v23 = vpack.c.bf16 %v706_v52, %v700_v21  ;;  %v699_v24 = vld [vmem:[#allocation10 + $0x180] sm:$0xff]  ;;  %v705_v25 = vld [vmem:[#allocation10 + $0x1b0] sm:$0xff]  ;;  %v712_v26 = vld [vmem:[#allocation10 + $0x1e8] sm:$0xff] }
 0x181   : > { %v718_v27 = vld [vmem:[#allocation10 + $0x218] sm:$0xff]  ;;  %v1503_v28 = vpack.c.bf16 %v705_v25, %v699_v24  ;;  %v711_v29 = vld [vmem:[#allocation10 + $0x1e0] sm:$0xff]  ;;  %v717_v32 = vld [vmem:[#allocation10 + $0x210] sm:$0xff] }
 0x182   : > { %1492 = vmatpush1.bf16.msra.mxu0 %v1491_v14  ;;  %v654_v30 = vld [vmem:[#allocation10 + $0x18] sm:$0xff]  ;;  %v1505_v31 = vpack.c.bf16 %v718_v27, %v712_v26  ;;  %v724_v33 = vld [vmem:[#allocation10 + $0x248] sm:$0xff]  ;;  %v653_v37 = vld [vmem:[#allocation10 + $0x10] sm:$0xff]  ;;  %v1507_v42 = vpack.c.bf16 %v717_v32, %v711_v29 }
 0x183   : > { %1494 = vmatprep.subr.bf16.mxu0 %v1493_v15  ;;  %v660_v34 = vld [vmem:[#allocation10 + $0x48] sm:$0xff]  ;;  %v730_v35 = vld [vmem:[#allocation10 + $0x278] sm:$0xff]  ;;  %v659_v38 = vld [vmem:[#allocation10 + $0x40] sm:$0xff] }
 0x184   : > { %v1549_v36 = vpack.c.bf16 %v660_v34, %v654_v30  ;;  %v1551_v39 = vpack.c.bf16 %v659_v38, %v653_v37  ;;  %v666_v40 = vld [vmem:[#allocation10 + $0x78] sm:$0xff]  ;;  %v672_v41 = vld [vmem:[#allocation10 + $0xa8] sm:$0xff]  ;;  %v723_v43 = vld [vmem:[#allocation10 + $0x240] sm:$0xff]  ;;  %v1509_v62 = vpack.c.bf16 %v730_v35, %v724_v33 }
 0x185   : > { %v1553_v59 = vpack.c.bf16 %v672_v41, %v666_v40  ;;  %v665_v61 = vld [vmem:[#allocation10 + $0x70] sm:$0xff]  ;;  %v736_v0 = vld [vmem:[#allocation10 + $0x2a8] sm:$0xff]  ;;  %v671_v7 = vld [vmem:[#allocation10 + $0xa0] sm:$0xff] }
 0x186   : > { %1496 = vmatpush1.bf16.msra.mxu0 %v1495_v51  ;;  %1550 = vmatprep.subr.bf16.mxu1 %v1549_v36  ;;  %v729_v63 = vld [vmem:[#allocation10 + $0x270] sm:$0xff]  ;;  %v742_v8 = vld [vmem:[#allocation10 + $0x2d8] sm:$0xff]  ;;  %v1555_v9 = vpack.c.bf16 %v671_v7, %v665_v61  ;;  %v684_v11 = vld [vmem:[#allocation10 + $0x108] sm:$0xff] }
 0x187   : > { %1498 = vmatprep.subr.bf16.mxu0 %v1497_v19  ;;  %1552 = vmatpush1.bf16.msra.mxu1 %v1551_v39  ;;  %v678_v10 = vld [vmem:[#allocation10 + $0xd8] sm:$0xff]  ;;  %v677_v13 = vld [vmem:[#allocation10 + $0xd0] sm:$0xff]  ;;  %v683_v49 = vld [vmem:[#allocation10 + $0x100] sm:$0xff]  ;;  %v1511_v14 = vpack.c.bf16 %v729_v63, %v723_v43  ;;  %v1513_v17 = vpack.c.bf16 %v742_v8, %v736_v0 }
 0x188   : > { %1554 = vmatprep.subr.bf16.mxu1 %v1553_v59  ;;  %v1557_v12 = vpack.c.bf16 %v684_v11, %v678_v10  ;;  %v735_v15 = vld [vmem:[#allocation10 + $0x2a0] sm:$0xff]  ;;  %v690_v16 = vld [vmem:[#allocation10 + $0x138] sm:$0xff]  ;;  %v741_v18 = vld [vmem:[#allocation10 + $0x2d0] sm:$0xff]  ;;  %v1559_v51 = vpack.c.bf16 %v683_v49, %v677_v13 }
 0x189   : > { %v748_v50 = vld [vmem:[#allocation10 + $0x308] sm:$0xff]  ;;  %v754_v46 = vld [vmem:[#allocation10 + $0x338] sm:$0xff]  ;;  %v689_v21 = vld [vmem:[#allocation10 + $0x130] sm:$0xff]  ;;  %v1515_v24 = vpack.c.bf16 %v741_v18, %v735_v15 }
 0x18a   : > { %1500 = vmatpush1.bf16.msra.mxu0 %v1499_v22  ;;  %v696_v19 = vld [vmem:[#allocation10 + $0x168] sm:$0xff]  ;;  %v695_v52 = vld [vmem:[#allocation10 + $0x160] sm:$0xff]  ;;  %v702_v22 = vld [vmem:[#allocation10 + $0x198] sm:$0xff]  ;;  %v1517_v25 = vpack.c.bf16 %v754_v46, %v748_v50 }
 0x18b   : > { %1502 = vmatprep.subr.bf16.mxu0 %v1501_v23  ;;  %1556 = vmatpush1.bf16.msra.mxu1 %v1555_v9  ;;  %v1561_v20 = vpack.c.bf16 %v696_v19, %v690_v16  ;;  %v708_v23 = vld [vmem:[#allocation10 + $0x1c8] sm:$0xff]  ;;  %v747_v26 = vld [vmem:[#allocation10 + $0x300] sm:$0xff]  ;;  %v753_v27 = vld [vmem:[#allocation10 + $0x330] sm:$0xff]  ;;  %v1563_v29 = vpack.c.bf16 %v695_v52, %v689_v21 }
 0x18c   : > { %1558 = vmatprep.subr.bf16.mxu1 %v1557_v12  ;;  %v766_v30 = vld [vmem:[#allocation10 + $0x398] sm:$0xff]  ;;  %v701_v32 = vld [vmem:[#allocation10 + $0x190] sm:$0xff]  ;;  %v707_v33 = vld [vmem:[#allocation10 + $0x1c0] sm:$0xff]  ;;  %v1519_v36 = vpack.c.bf16 %v753_v27, %v747_v26 }
 0x18d   : > { %v714_v34 = vld [vmem:[#allocation10 + $0x1f8] sm:$0xff]  ;;  %v720_v35 = vld [vmem:[#allocation10 + $0x228] sm:$0xff]  ;;  %v759_v38 = vld [vmem:[#allocation10 + $0x360] sm:$0xff]  ;;  %v1567_v41 = vpack.c.bf16 %v707_v33, %v701_v32 }
 0x18e   : > { %1504 = vmatpush1.bf16.msra.mxu0 %v1503_v28  ;;  %v760_v28 = vld [vmem:[#allocation10 + $0x368] sm:$0xff]  ;;  %v765_v39 = vld [vmem:[#allocation10 + $0x390] sm:$0xff]  ;;  %v1569_v43 = vpack.c.bf16 %v720_v35, %v714_v34  ;;  %v719_v61 = vld [vmem:[#allocation10 + $0x220] sm:$0xff] }
 0x18f   : > { %1506 = vmatprep.subr.bf16.mxu0 %v1505_v31  ;;  %1560 = vmatpush1.bf16.msra.mxu1 %v1559_v51  ;;  %v1565_v31 = vpack.c.bf16 %v708_v23, %v702_v22  ;;  %v1521_v37 = vpack.c.bf16 %v766_v30, %v760_v28  ;;  %v772_v40 = vld [vmem:[#allocation10 + $0x3c8] sm:$0xff]  ;;  %v713_v59 = vld [vmem:[#allocation10 + $0x1f0] sm:$0xff]  ;;  %v1523_v0 = vpack.c.bf16 %v765_v39, %v759_v38  ;;  %v771_v8 = vld [vmem:[#allocation10 + $0x3c0] sm:$0xff] }
 0x190   : > { %1562 = vmatprep.subr.bf16.mxu1 %v1561_v20  ;;  %v732_v63 = vld [vmem:[#allocation10 + $0x288] sm:$0xff]  ;;  %v777_v9 = vld [vmem:[#allocation10 + $0x3f0] sm:$0xff]  ;;  %v1571_v11 = vpack.c.bf16 %v719_v61, %v713_v59  ;;  %v790_v12 = vld [vmem:[#allocation10 + $0x458] sm:$0xff] }
 0x191   : > { %v784_v10 = vld [vmem:[#allocation10 + $0x428] sm:$0xff]  ;;  %v725_v49 = vld [vmem:[#allocation10 + $0x250] sm:$0xff]  ;;  %v738_v15 = vld [vmem:[#allocation10 + $0x2b8] sm:$0xff] }
 0x192   : > { %1508 = vmatpush1.bf16.msra.mxu0 %v1507_v42  ;;  %v778_v42 = vld [vmem:[#allocation10 + $0x3f8] sm:$0xff]  ;;  %v744_v16 = vld [vmem:[#allocation10 + $0x2e8] sm:$0xff]  ;;  %v1529_v18 = vpack.c.bf16 %v790_v12, %v784_v10  ;;  %v783_v50 = vld [vmem:[#allocation10 + $0x420] sm:$0xff] }
 0x193   : > { %1510 = vmatprep.subr.bf16.mxu0 %v1509_v62  ;;  %1564 = vmatpush1.bf16.msra.mxu1 %v1563_v29  ;;  %v726_v62 = vld [vmem:[#allocation10 + $0x258] sm:$0xff]  ;;  %v1525_v7 = vpack.c.bf16 %v778_v42, %v772_v40  ;;  %v789_v51 = vld [vmem:[#allocation10 + $0x450] sm:$0xff]  ;;  %v796_v19 = vld [vmem:[#allocation10 + $0x488] sm:$0xff]  ;;  %v1577_v21 = vpack.c.bf16 %v744_v16, %v738_v15 }
 0x194   : > { %1566 = vmatprep.subr.bf16.mxu1 %v1565_v31  ;;  %v1573_v13 = vpack.c.bf16 %v732_v63, %v726_v62  ;;  %v802_v20 = vld [vmem:[#allocation10 + $0x4b8] sm:$0xff]  ;;  %v737_v52 = vld [vmem:[#allocation10 + $0x2b0] sm:$0xff]  ;;  %v743_v22 = vld [vmem:[#allocation10 + $0x2e0] sm:$0xff] }
 0x195   : > { %v750_v23 = vld [vmem:[#allocation10 + $0x318] sm:$0xff]  ;;  %v1533_v26 = vpack.c.bf16 %v802_v20, %v796_v19  ;;  %v795_v27 = vld [vmem:[#allocation10 + $0x480] sm:$0xff]  ;;  %v801_v28 = vld [vmem:[#allocation10 + $0x4b0] sm:$0xff]  ;;  %v1579_v30 = vpack.c.bf16 %v743_v22, %v737_v52 }
 0x196   : > { %1512 = vmatpush1.bf16.msra.mxu0 %v1511_v14  ;;  %v731_v14 = vld [vmem:[#allocation10 + $0x280] sm:$0xff]  ;;  %v808_v29 = vld [vmem:[#allocation10 + $0x4e8] sm:$0xff]  ;;  %v814_v31 = vld [vmem:[#allocation10 + $0x518] sm:$0xff] }
 0x197   : > { %1514 = vmatprep.subr.bf16.mxu0 %v1513_v17  ;;  %1568 = vmatpush1.bf16.msra.mxu1 %v1567_v41  ;;  %v1527_v17 = vpack.c.bf16 %v777_v9, %v771_v8  ;;  %v1575_v46 = vpack.c.bf16 %v731_v14, %v725_v49  ;;  %v749_v33 = vld [vmem:[#allocation10 + $0x310] sm:$0xff]  ;;  %v755_v34 = vld [vmem:[#allocation10 + $0x340] sm:$0xff]  ;;  %v762_v35 = vld [vmem:[#allocation10 + $0x378] sm:$0xff]  ;;  %v1537_v38 = vpack.c.bf16 %v814_v31, %v808_v29 }
 0x198   : > { %1570 = vmatprep.subr.bf16.mxu1 %v1569_v43  ;;  %v807_v39 = vld [vmem:[#allocation10 + $0x4e0] sm:$0xff]  ;;  %v813_v40 = vld [vmem:[#allocation10 + $0x510] sm:$0xff]  ;;  %v820_v41 = vld [vmem:[#allocation10 + $0x548] sm:$0xff]  ;;  %v1583_v42 = vpack.c.bf16 %v755_v34, %v749_v33 }
 0x199   : > { %v826_v43 = vld [vmem:[#allocation10 + $0x578] sm:$0xff]  ;;  %v761_v61 = vld [vmem:[#allocation10 + $0x370] sm:$0xff]  ;;  %v767_v62 = vld [vmem:[#allocation10 + $0x3a0] sm:$0xff] }
 0x19a   : > { %1516 = vmatpush1.bf16.msra.mxu0 %v1515_v24  ;;  %v756_v24 = vld [vmem:[#allocation10 + $0x348] sm:$0xff]  ;;  %v774_v63 = vld [vmem:[#allocation10 + $0x3d8] sm:$0xff]  ;;  %v1541_v8 = vpack.c.bf16 %v826_v43, %v820_v41  ;;  %v819_v9 = vld [vmem:[#allocation10 + $0x540] sm:$0xff]  ;;  %v1587_v12 = vpack.c.bf16 %v767_v62, %v761_v61 }
 0x19b   : > { %1518 = vmatprep.subr.bf16.mxu0 %v1517_v25  ;;  %1572 = vmatpush1.bf16.msra.mxu1 %v1571_v11  ;;  %v1531_v25 = vpack.c.bf16 %v789_v51, %v783_v50  ;;  %v1581_v32 = vpack.c.bf16 %v756_v24, %v750_v23  ;;  %v825_v10 = vld [vmem:[#allocation10 + $0x570] sm:$0xff]  ;;  %v832_v11 = vld [vmem:[#allocation10 + $0x5a8] sm:$0xff]  ;;  %v779_v15 = vld [vmem:[#allocation10 + $0x400] sm:$0xff] }
 0x19c   : > { %1574 = vmatprep.subr.bf16.mxu1 %v1573_v13  ;;  %v838_v13 = vld [vmem:[#allocation10 + $0x5d8] sm:$0xff]  ;;  %v773_v14 = vld [vmem:[#allocation10 + $0x3d0] sm:$0xff]  ;;  %v831_v51 = vld [vmem:[#allocation10 + $0x5a0] sm:$0xff] }
 0x19d   : > { %v786_v16 = vld [vmem:[#allocation10 + $0x438] sm:$0xff]  ;;  %v1545_v50 = vpack.c.bf16 %v838_v13, %v832_v11  ;;  %v837_v19 = vld [vmem:[#allocation10 + $0x5d0] sm:$0xff]  ;;  %v1591_v20 = vpack.c.bf16 %v779_v15, %v773_v14  ;;  %v791_v23 = vld [vmem:[#allocation10 + $0x460] sm:$0xff] }
 0x19e   : > { %1520 = vmatpush1.bf16.msra.mxu0 %v1519_v36  ;;  %v768_v36 = vld [vmem:[#allocation10 + $0x3a8] sm:$0xff]  ;;  %v785_v22 = vld [vmem:[#allocation10 + $0x430] sm:$0xff]  ;;  %v798_v24 = vld [vmem:[#allocation10 + $0x498] sm:$0xff] }
 0x19f   : > { %1522 = vmatprep.subr.bf16.mxu0 %v1521_v37  ;;  %1576 = vmatpush1.bf16.msra.mxu1 %v1575_v46  ;;  %v1535_v37 = vpack.c.bf16 %v801_v28, %v795_v27  ;;  %v1585_v59 = vpack.c.bf16 %v768_v36, %v762_v35  ;;  %v656_v46 = vld [vmem:[#allocation10 + $0x28] sm:$0xff]  ;;  %v655_v28 = vld [vmem:[#allocation10 + $0x20] sm:$0xff]  ;;  %v661_v29 = vld [vmem:[#allocation10 + $0x50] sm:$0xff]  ;;  %v1595_v31 = vpack.c.bf16 %v791_v23, %v785_v22 }
 0x1a0   : > { %1578 = vmatprep.subr.bf16.mxu1 %v1577_v21  ;;  %v662_v21 = vld [vmem:[#allocation10 + $0x58] sm:$0xff]  ;;  %v797_v34 = vld [vmem:[#allocation10 + $0x490] sm:$0xff]  ;;  %v803_v35 = vld [vmem:[#allocation10 + $0x4c0] sm:$0xff] }
 0x1a1   : > { %v1613_v27 = vpack.c.bf16 %v662_v21, %v656_v46  ;;  %v810_v36 = vld [vmem:[#allocation10 + $0x4f8] sm:$0xff]  ;;  %v673_v41 = vld [vmem:[#allocation10 + $0xb0] sm:$0xff]  ;;  %v1599_v43 = vpack.c.bf16 %v803_v35, %v797_v34  ;;  %v715_v34 = vld [vmem:[#allocation10 + $0x200] sm:$0xff] }
 0x1a2   : > { %1524 = vmatpush1.bf16.msra.mxu0 %v1523_v0  ;;  %v780_v0 = vld [vmem:[#allocation10 + $0x408] sm:$0xff]  ;;  %v809_v62 = vld [vmem:[#allocation10 + $0x4f0] sm:$0xff] }
 0x1a3   : > { %1526 = vmatprep.subr.bf16.mxu0 %v1525_v7  ;;  %1580 = vmatpush1.bf16.msra.mxu1 %v1579_v30  ;;  %v1539_v7 = vpack.c.bf16 %v813_v40, %v807_v39  ;;  %v1589_v49 = vpack.c.bf16 %v780_v0, %v774_v63  ;;  %v668_v30 = vld [vmem:[#allocation10 + $0x88] sm:$0xff]  ;;  %v667_v40 = vld [vmem:[#allocation10 + $0x80] sm:$0xff]  ;;  %v822_v0 = vld [vmem:[#allocation10 + $0x558] sm:$0xff] }
 0x1a4   : > { %1582 = vmatprep.subr.bf16.mxu1 %v1581_v32  ;;  %v674_v32 = vld [vmem:[#allocation10 + $0xb8] sm:$0xff]  ;;  %v815_v63 = vld [vmem:[#allocation10 + $0x520] sm:$0xff]  ;;  %v685_v11 = vld [vmem:[#allocation10 + $0x110] sm:$0xff] }
 0x1a5   : > { %v1617_v39 = vpack.c.bf16 %v674_v32, %v668_v30  ;;  %v1603_v13 = vpack.c.bf16 %v815_v63, %v809_v62  ;;  %v821_v15 = vld [vmem:[#allocation10 + $0x550] sm:$0xff]  ;;  %v716_v30 = vld [vmem:[#allocation10 + $0x208] sm:$0xff]  ;;  %v739_v62 = vld [vmem:[#allocation10 + $0x2c0] sm:$0xff] }
 0x1a6   : > { %1528 = vmatpush1.bf16.msra.mxu0 %v1527_v17  ;;  %v792_v17 = vld [vmem:[#allocation10 + $0x468] sm:$0xff]  ;;  %v697_v46 = vld [vmem:[#allocation10 + $0x170] sm:$0xff] }
 0x1a7   : > { %1530 = vmatprep.subr.bf16.mxu0 %v1529_v18  ;;  %1584 = vmatpush1.bf16.msra.mxu1 %v1583_v42  ;;  %v1543_v18 = vpack.c.bf16 %v825_v10, %v819_v9  ;;  %v1593_v52 = vpack.c.bf16 %v792_v17, %v786_v16  ;;  %v680_v42 = vld [vmem:[#allocation10 + $0xe8] sm:$0xff]  ;;  %v679_v10 = vld [vmem:[#allocation10 + $0xe0] sm:$0xff]  ;;  %v834_v17 = vld [vmem:[#allocation10 + $0x5b8] sm:$0xff] }
 0x1a8   : > { %1586 = vmatprep.subr.bf16.mxu1 %v1585_v59  ;;  %v686_v59 = vld [vmem:[#allocation10 + $0x118] sm:$0xff]  ;;  %v827_v16 = vld [vmem:[#allocation10 + $0x580] sm:$0xff]  ;;  %v833_v23 = vld [vmem:[#allocation10 + $0x5b0] sm:$0xff] }
 0x1a9   : > { %v1621_v9 = vpack.c.bf16 %v686_v59, %v680_v42  ;;  %v1607_v21 = vpack.c.bf16 %v827_v16, %v821_v15  ;;  %v721_v35 = vld [vmem:[#allocation10 + $0x230] sm:$0xff]  ;;  %v740_v42 = vld [vmem:[#allocation10 + $0x2c8] sm:$0xff]  ;;  %v763_v15 = vld [vmem:[#allocation10 + $0x380] sm:$0xff] }
 0x1aa   : > { %1532 = vmatpush1.bf16.msra.mxu0 %v1531_v25  ;;  %v804_v25 = vld [vmem:[#allocation10 + $0x4c8] sm:$0xff]  ;;  %v745_v63 = vld [vmem:[#allocation10 + $0x2f0] sm:$0xff] }
 0x1ab   : > { %1534 = vmatprep.subr.bf16.mxu0 %v1533_v26  ;;  %1588 = vmatpush1.bf16.msra.mxu1 %v1587_v12  ;;  %v1547_v26 = vpack.c.bf16 %v837_v19, %v831_v51  ;;  %v1597_v33 = vpack.c.bf16 %v804_v25, %v798_v24  ;;  %v692_v12 = vld [vmem:[#allocation10 + $0x148] sm:$0xff]  ;;  %v691_v19 = vld [vmem:[#allocation10 + $0x140] sm:$0xff]  ;;  %v769_v16 = vld [vmem:[#allocation10 + $0x3b0] sm:$0xff] }
 0x1ac   : > { %1590 = vmatprep.subr.bf16.mxu1 %v1589_v49  ;;  %v698_v49 = vld [vmem:[#allocation10 + $0x178] sm:$0xff]  ;;  %v839_v24 = vld [vmem:[#allocation10 + $0x5e0] sm:$0xff]  ;;  %v1627_v25 = vpack.c.bf16 %v697_v46, %v691_v19  ;;  %v781_v46 = vld [vmem:[#allocation10 + $0x410] sm:$0xff] }
 0x1ad   : > { %v1625_v51 = vpack.c.bf16 %v698_v49, %v692_v12  ;;  %v764_v12 = vld [vmem:[#allocation10 + $0x388] sm:$0xff]  ;;  %v775_v19 = vld [vmem:[#allocation10 + $0x3e0] sm:$0xff] }
 0x1ae   : > { %1536 = vmatpush1.bf16.msra.mxu0 %v1535_v37  ;;  %v816_v37 = vld [vmem:[#allocation10 + $0x528] sm:$0xff] }
 0x1af   : > { %1538 = vmatprep.subr.bf16.mxu0 %v1537_v38  ;;  %1592 = vmatpush1.bf16.msra.mxu1 %v1591_v20  ;;  %v1615_v38 = vpack.c.bf16 %v661_v29, %v655_v28  ;;  %v1601_v61 = vpack.c.bf16 %v816_v37, %v810_v36  ;;  %v704_v20 = vld [vmem:[#allocation10 + $0x1a8] sm:$0xff]  ;;  %v709_v28 = vld [vmem:[#allocation10 + $0x1d0] sm:$0xff]  ;;  %v1611_v29 = vpack.c.bf16 %v839_v24, %v833_v23  ;;  %v734_v37 = vld [vmem:[#allocation10 + $0x298] sm:$0xff] }
 0x1b0   : > { %1594 = vmatprep.subr.bf16.mxu1 %v1593_v52  ;;  %v710_v52 = vld [vmem:[#allocation10 + $0x1d8] sm:$0xff]  ;;  %v728_v36 = vld [vmem:[#allocation10 + $0x268] sm:$0xff]  ;;  %v787_v23 = vld [vmem:[#allocation10 + $0x440] sm:$0xff] }
 0x1b1   : > { %v793_v24 = vld [vmem:[#allocation10 + $0x470] sm:$0xff] }
 0x1b2   : > { %1540 = vmatpush1.bf16.msra.mxu0 %v1539_v7  ;;  %v828_v7 = vld [vmem:[#allocation10 + $0x588] sm:$0xff] }
 0x1b3   : > { %1542 = vmatprep.subr.bf16.mxu0 %v1541_v8  ;;  %1596 = vmatpush1.bf16.msra.mxu1 %v1595_v31  ;;  %v1619_v8 = vpack.c.bf16 %v673_v41, %v667_v40  ;;  %v1605_v14 = vpack.c.bf16 %v828_v7, %v822_v0  ;;  %v722_v31 = vld [vmem:[#allocation10 + $0x238] sm:$0xff]  ;;  %v727_v40 = vld [vmem:[#allocation10 + $0x260] sm:$0xff]  ;;  %v733_v41 = vld [vmem:[#allocation10 + $0x290] sm:$0xff] }
 0x1b4   : > { %1598 = vmatprep.subr.bf16.mxu1 %v1597_v33  ;;  %v1633_v33 = vpack.c.bf16 %v722_v31, %v716_v30  ;;  %v1639_v59 = vpack.c.bf16 %v733_v41, %v727_v40  ;;  %v752_v0 = vld [vmem:[#allocation10 + $0x328] sm:$0xff]  ;;  %v758_v7 = vld [vmem:[#allocation10 + $0x358] sm:$0xff]  ;;  %v805_v30 = vld [vmem:[#allocation10 + $0x4d0] sm:$0xff] }
 0x1b5   : > { %v812_v31 = vld [vmem:[#allocation10 + $0x508] sm:$0xff]  ;;  %v823_v41 = vld [vmem:[#allocation10 + $0x560] sm:$0xff] }
 0x1b6   : > { %1544 = vmatpush1.bf16.msra.mxu0 %v1543_v18  ;;  %v840_v18 = vld [vmem:[#allocation10 + $0x5e8] sm:$0xff] }
 0x1b7   : > { %1546 = vmatprep.subr.bf16.mxu0 %v1545_v50  ;;  %1600 = vmatpush1.bf16.msra.mxu1 %v1599_v43  ;;  %v1623_v50 = vpack.c.bf16 %v685_v11, %v679_v10  ;;  %v1609_v22 = vpack.c.bf16 %v840_v18, %v834_v17  ;;  %v746_v43 = vld [vmem:[#allocation10 + $0x2f8] sm:$0xff]  ;;  %v751_v10 = vld [vmem:[#allocation10 + $0x320] sm:$0xff]  ;;  %v757_v11 = vld [vmem:[#allocation10 + $0x350] sm:$0xff] }
 0x1b8   : > { %1602 = vmatprep.subr.bf16.mxu1 %v1601_v61  ;;  %v1641_v61 = vpack.c.bf16 %v746_v43, %v740_v42  ;;  %v1647_v49 = vpack.c.bf16 %v757_v11, %v751_v10  ;;  %v776_v17 = vld [vmem:[#allocation10 + $0x3e8] sm:$0xff]  ;;  %v782_v18 = vld [vmem:[#allocation10 + $0x418] sm:$0xff]  ;;  %v829_v42 = vld [vmem:[#allocation10 + $0x590] sm:$0xff]  ;;  %v2036_v11 = vmov 0.0|0.0  }
 0x1b9   : > { %v836_v43 = vld [vmem:[#allocation10 + $0x5c8] sm:$0xff]  ;;  %v1150_v10 = vld [vmem:[#allocation11 + $0x10] sm:$0xff] }
 0x1ba   : > { %1548 = vmatpush1.bf16.msra.mxu0 %v1547_v26  ;;  %v1629_v26 = vpack.c.bf16 %v710_v52, %v704_v20  ;;  %v788_v20 = vld [vmem:[#allocation10 + $0x448] sm:$0xff]  ;;  %v1655_v52 = vpack.c.bf16 %v781_v46, %v775_v19 }
 0x1bb   : > { %1614 = vmatprep.subr.bf16.mxu0 %v1613_v27  ;;  %1604 = vmatpush1.bf16.msra.mxu1 %v1603_v13  ;;  %v703_v27 = vld [vmem:[#allocation10 + $0x1a0] sm:$0xff]  ;;  %v770_v13 = vld [vmem:[#allocation10 + $0x3b8] sm:$0xff]  ;;  %v1157_v19 = vld [vmem:[#allocation11 + $0x48] sm:$0xff] }
 0x1bc   : > { %1606 = vmatprep.subr.bf16.mxu1 %v1605_v14  ;;  %v1631_v32 = vpack.c.bf16 %v709_v28, %v703_v27  ;;  %v1649_v14 = vpack.c.bf16 %v770_v13, %v764_v12  ;;  %v1659_v27 = vpack.c.bf16 %v793_v24, %v787_v23  ;;  %v1151_v13 = vld [vmem:[#allocation11 + $0x18] sm:$0xff]  ;;  %v1161_v23 = vld [vmem:[#allocation11 + $0x68] sm:$0xff]  ;;  %v2038_v24 = vmov 0.0  }
 0x1bd   : > { %939 = vmatmul.mubr.f32.vlgmr.msra.gmra.mrb[0].mxu0 %v2009_v58 }
 0x1be   : > { %1616 = vmatpush1.bf16.msra.mxu0 %v1615_v38  ;;  %1080 = vmatprep.mubr.f32.mxu0 %v2005_v57  ;;  %v1635_v38 = vpack.c.bf16 %v721_v35, %v715_v34  ;;  %v811_v35 = vld [vmem:[#allocation10 + $0x500] sm:$0xff] }
 0x1bf   : > { %1618 = vmatprep.subr.bf16.mxu0 %v1617_v39  ;;  %1608 = vmatpush1.bf16.msra.mxu1 %v1607_v21  ;;  %v1637_v39 = vpack.c.bf16 %v734_v37, %v728_v36  ;;  %v794_v21 = vld [vmem:[#allocation10 + $0x478] sm:$0xff]  ;;  %v817_v36 = vld [vmem:[#allocation10 + $0x530] sm:$0xff]  ;;  %v824_v37 = vld [vmem:[#allocation10 + $0x568] sm:$0xff] }
 0x1c0   : > { %1610 = vmatprep.subr.bf16.mxu1 %v1609_v22  ;;  %v1657_v22 = vpack.c.bf16 %v794_v21, %v788_v20  ;;  %v1158_v20 = vld [vmem:[#allocation11 + $0x50] sm:$0xff]  ;;  %v1159_v21 = vld [vmem:[#allocation11 + $0x58] sm:$0xff] }
 0x1c2   : > { %1620 = vmatpush1.bf16.msra.mxu0 %v1619_v8  ;;  %v1643_v8 = vpack.c.bf16 %v745_v63, %v739_v62  ;;  %v835_v63 = vld [vmem:[#allocation10 + $0x5c0] sm:$0xff] }
 0x1c3   : > { %1622 = vmatprep.subr.bf16.mxu0 %v1621_v9  ;;  %1612 = vmatpush1.bf16.msra.mxu1 %v1611_v29  ;;  %v1645_v9 = vpack.c.bf16 %v758_v7, %v752_v0  ;;  %v799_v29 = vld [vmem:[#allocation10 + $0x4a0] sm:$0xff]  ;;  %v841_v0 = vld [vmem:[#allocation10 + $0x5f0] sm:$0xff] }
 0x1c4   : > { %v1675_v7 = vpack.c.bf16 %v841_v0, %v835_v63  ;;  %1677 = vmatprep.subr.bf16.mxu1 %v2036_v11  ;;  %v646_v0 = vld [vmem:[%s2363_s2 + $0x18] sm:$0xff] }
 0x1c6   : > { %1624 = vmatpush1.bf16.msra.mxu0 %v1623_v50  ;;  %1010 = vmatmul.mubr.f32.vlgmr.msra.gmra.mrb[0].mxu1 %v2009_v58  ;;  %v1651_v50 = vpack.c.bf16 %v769_v16, %v763_v15  ;;  %v1153_v15 = vld [vmem:[#allocation11 + $0x28] sm:$0xff] }
 0x1c7   : > { %1626 = vmatprep.subr.bf16.mxu0 %v1625_v51  ;;  %v1653_v51 = vpack.c.bf16 %v782_v18, %v776_v17  ;;  %v1154_v17 = vld [vmem:[#allocation11 + $0x30] sm:$0xff]  ;;  %v1155_v18 = vld [vmem:[#allocation11 + $0x38] sm:$0xff]  ;;  %1386 = vmatprep.mubr.msk.f32.mxu1 %vm2037_vm0, %v2038_v24  ;;  %v648_v24 = vld [vmem:[%s2363_s2 + $0x28] sm:$0xff] }
 0x1ca   : > { %1628 = vmatpush1.bf16.msra.mxu0 %v1627_v25  ;;  %v800_v25 = vld [vmem:[#allocation10 + $0x4a8] sm:$0xff] }
 0x1cb   : > { %1630 = vmatprep.subr.bf16.mxu0 %v1629_v26  ;;  %v806_v26 = vld [vmem:[#allocation10 + $0x4d8] sm:$0xff] }
 0x1cc   : > { %v1661_v28 = vpack.c.bf16 %v806_v26, %v800_v25  ;;  %v1162_v26 = vld [vmem:[#allocation11 + $0x70] sm:$0xff] }
 0x1ce   : > { %1632 = vmatpush1.bf16.msra.mxu0 %v1631_v32  ;;  %v818_v32 = vld [vmem:[#allocation10 + $0x538] sm:$0xff] }
 0x1cf   : > { %1634 = vmatprep.subr.bf16.mxu0 %v1633_v33  ;;  %v1663_v33 = vpack.c.bf16 %v805_v30, %v799_v29  ;;  %v1665_v34 = vpack.c.bf16 %v818_v32, %v812_v31 }
 0x1d2   : > { %1636 = vmatpush1.bf16.msra.mxu0 %v1635_v38  ;;  %v830_v38 = vld [vmem:[#allocation10 + $0x598] sm:$0xff] }
 0x1d3   : > { %1638 = vmatprep.subr.bf16.mxu0 %v1637_v39  ;;  %v1667_v39 = vpack.c.bf16 %v817_v36, %v811_v35  ;;  %v1669_v40 = vpack.c.bf16 %v830_v38, %v824_v37  ;;  %v643_v36 = vld [vmem:[%s2363_s2] sm:$0xff]  ;;  %v644_v38 = vld [vmem:[%s2363_s2 + $0x8] sm:$0xff] }
 0x1d6   : > { %1640 = vmatpush1.bf16.msra.mxu0 %v1639_v59  ;;  %v842_v59 = vld [vmem:[#allocation10 + $0x5f8] sm:$0xff] }
 0x1d7   : > { %1642 = vmatprep.subr.bf16.mxu0 %v1641_v61  ;;  %v1671_v61 = vpack.c.bf16 %v829_v42, %v823_v41  ;;  %v1673_v62 = vpack.c.bf16 %v842_v59, %v836_v43  ;;  %v855_v41 = vrot.slane %v2189_v5, %v213_v47  ;;  %v859_v42 = vrot.slane %v2189_v5, %v217_v1 }
 0x1da   : > { %1644 = vmatpush1.bf16.msra.mxu0 %v1643_v8  ;;  %v1148_v8 = vld [vmem:[#allocation11] sm:$0xff] }
 0x1db   : > { %1646 = vmatprep.subr.bf16.mxu0 %v1645_v9  ;;  %v1149_v9 = vld [vmem:[#allocation11 + $0x8] sm:$0xff] }
 0x1dc   : > { %v1678_v12 = vpack.c.bf16 %v1149_v9, %v1148_v8 }
 0x1de   : > { %1648 = vmatpush1.bf16.msra.mxu0 %v1647_v49  ;;  %1679 = vmatpush3.bf16.msra.mxu1 %v1678_v12  ;;  %v1681_v49 = vpack.c.bf16 %v1151_v13, %v1150_v10 }
 0x1df   : > { %1650 = vmatprep.subr.bf16.mxu0 %v1649_v14  ;;  %1680 = vmatprep.subr.bf16.mxu1 %v2036_v11  ;;  %v1152_v14 = vld [vmem:[#allocation11 + $0x20] sm:$0xff] }
 0x1e0   : > { %v1684_v16 = vpack.c.bf16 %v1153_v15, %v1152_v14 }
 0x1e2   : > { %1652 = vmatpush1.bf16.msra.mxu0 %v1651_v50  ;;  %1682 = vmatpush3.bf16.msra.mxu1 %v1681_v49  ;;  %v1687_v50 = vpack.c.bf16 %v1155_v18, %v1154_v17  ;;  %v863_v17 = vrot.slane %v2189_v5, %v221_v56 }
 0x1e3   : > { %1654 = vmatprep.subr.bf16.mxu0 %v1653_v51  ;;  %1683 = vmatprep.subr.bf16.mxu1 %v2036_v11  ;;  %v1156_v51 = vld [vmem:[#allocation11 + $0x40] sm:$0xff] }
 0x1e4   : > { %v1690_v46 = vpack.c.bf16 %v1157_v19, %v1156_v51 }
 0x1e6   : > { %1656 = vmatpush1.bf16.msra.mxu0 %v1655_v52  ;;  %1685 = vmatpush3.bf16.msra.mxu1 %v1684_v16  ;;  %v1693_v52 = vpack.c.bf16 %v1159_v21, %v1158_v20  ;;  %v647_v21 = vld [vmem:[%s2363_s2 + $0x20] sm:$0xff] }
 0x1e7   : > { %1658 = vmatprep.subr.bf16.mxu0 %v1657_v22  ;;  %1686 = vmatprep.subr.bf16.mxu1 %v2036_v11  ;;  %v1160_v22 = vld [vmem:[#allocation11 + $0x60] sm:$0xff] }
 0x1e8   : > { %v1696_v25 = vpack.c.bf16 %v1161_v23, %v1160_v22 }
 0x1ea   : > { %1660 = vmatpush1.bf16.msra.mxu0 %v1659_v27  ;;  %1688 = vmatpush3.bf16.msra.mxu1 %v1687_v50  ;;  %v1163_v27 = vld [vmem:[#allocation11 + $0x78] sm:$0xff]  ;;  %v867_v50 = vrot.slane %v2189_v5, %v225_v60 }
 0x1eb   : > { %1662 = vmatprep.subr.bf16.mxu0 %v1661_v28  ;;  %1689 = vmatprep.subr.bf16.mxu1 %v2036_v11  ;;  %v1699_v28 = vpack.c.bf16 %v1163_v27, %v1162_v26 }
 0x1ee   : > { %1664 = vmatpush1.bf16.msra.mxu0 %v1663_v33  ;;  %1691 = vmatpush3.bf16.msra.mxu1 %v1690_v46  ;;  %v847_v33 = vrot.slane %v2189_v5, %v2241_v45 }
 0x1ef   : > { %1666 = vmatprep.subr.bf16.mxu0 %v1665_v34  ;;  %1692 = vmatprep.subr.bf16.mxu1 %v2036_v11  ;;  %v851_v34 = vrot.slane %v2189_v5, %v209_v48 }
 0x1f2   : > { %1668 = vmatpush1.bf16.msra.mxu0 %v1667_v39  ;;  %1694 = vmatpush3.bf16.msra.mxu1 %v1693_v52 }
 0x1f3   : > { %1670 = vmatprep.subr.bf16.mxu0 %v1669_v40  ;;  %1695 = vmatprep.subr.bf16.mxu1 %v2036_v11 }
 0x1f6   : > { %1672 = vmatpush1.bf16.msra.mxu0 %v1671_v61  ;;  %1697 = vmatpush3.bf16.msra.mxu1 %v1696_v25 }
 0x1f7   : > { %1674 = vmatprep.subr.bf16.mxu0 %v1673_v62  ;;  %1698 = vmatprep.subr.bf16.mxu1 %v2036_v11  ;;  %v645_v62 = vld [vmem:[%s2363_s2 + $0x10] sm:$0xff] }
 0x1fa   : > { %1676 = vmatpush1.bf16.msra.mxu0 %v1675_v7  ;;  %1700 = vmatpush3.bf16.msra.mxu1 %v1699_v28 }
 0x1fd   : > { %1081 = vmatmul.mubr.f32.vlgmr.msra.gmra.mrb[2].mxu0 %v2009_v58 }
 0x290   : > { %v940_v29 = vpop.f32.mrb[0].mxu0 }
 0x291   : > { %v942_v30 = vpop.f32.mrb[1].mxu0  ;;  %v941_v35 = vadd.f32 %v940_v29, %v847_v33 }
 0x292   : > { %v943_v37 = vadd.f32 %v942_v30, %v851_v34 }
 0x293   : > { %v1087_v39 = vadd.f32 %v941_v35, %v643_v36 }
 0x294   : > { %v1088_v40 = vadd.f32 %v943_v37, %v644_v38 }
 0x295   : > { %v1330_v43 = vmul.f32 -1.442695, %v1087_v39  ;;  %v2039_v39 = vmov 0  }
 0x296   : > { %v1331_v59 = vmul.f32 -1.442695, %v1088_v40  ;;  %1805 = vset.pattern.permute.xlu1 %v2039_v39  ;;  %1804 = vset.pattern.permute.xlu0 %v2039_v39  ;;  %v1142_v40 = vrot.slane %v2179_v3, %v2241_v45 }
 0x297   : > { %1806 = vpow2.f32 %v1330_v43 }
 0x298   : > { %1808 = vpow2.f32 %v1331_v59 }
 0x299   : > { %v1011_v31 = vpop.f32.mrb[0].mxu1 }
 0x29a   : > { %v1013_v32 = vpop.f32.mrb[1].mxu1  ;;  %v1012_v61 = vadd.f32 %v1011_v31, %v855_v41  ;;  %v1145_v41 = vstv %s2013_s10  ;;  %s629_s10 = sadd.s32 1, %s2013_s10  }
 0x29b   : > { %v1014_v63 = vadd.f32 %v1013_v32, %v859_v42  ;;  %vm1146_vm1 = vcmp.lt.s32.totalorder %v1145_v41, %v2177_v2  ;;  %p628_p5 = scmp.ge.s32.totalorder %s629_s10, %s2439_s0 }
 0x29c   : > { %v1101_v7 = vadd.f32 %v1012_v61, %v645_v62 }
 0x29d   : > { %v1102_v8 = vadd.f32 %v1014_v63, %v646_v0 }
 0x29e   : > { %v1332_v9 = vmul.f32 -1.442695, %v1101_v7 }
 0x29f   : > { %v1333_v10 = vmul.f32 -1.442695, %v1102_v8 }
 0x2a0   : > { %1810 = vpow2.f32 %v1332_v9 }
 0x2a1   : > { %v1807_v11 = vpop.eup %1806  ;;  %1812 = vpow2.f32 %v1333_v10 }
 0x2a2   : > { %v1809_v12 = vpop.eup %1808  ;;  %v1095_v13 = vadd.f32 1.0, %v1807_v11 }
 0x2a3   : > { %v1096_v49 = vadd.f32 1.0, %v1809_v12 }
 0x2a4   : > { %1814 = vrcp.f32 %v1095_v13 }
 0x2a5   : > { %1816 = vrcp.f32 %v1096_v49 }
 0x2aa   : > { %v1811_v14 = vpop.eup %1810 }
 0x2ab   : > { %v1813_v15 = vpop.eup %1812  ;;  %v1109_v16 = vadd.f32 1.0, %v1811_v14 }
 0x2ac   : > { %v1110_v18 = vadd.f32 1.0, %v1813_v15 }
 0x2ad   : > { %1818 = vrcp.f32 %v1109_v16 }
 0x2ae   : > { %v1815_v20 = vpop.eup %1814  ;;  %1820 = vrcp.f32 %v1110_v18 }
 0x2af   : > { %v1817_v22 = vpop.eup %1816 }
 0x2b7   : > { %v1819_v28 = vpop.eup %1818 }
 0x2b8   : > { %v1821_v29 = vpop.eup %1820  ;;  %v1121_v30 = vsub.f32 1.0, %v1819_v28  ;;  %v1125_v35 = vmul.f32 %v2009_v58, %v1819_v28 }
 0x2b9   : > { %v1122_v31 = vsub.f32 1.0, %v1821_v29  ;;  %v1126_v37 = vmul.f32 %v2005_v57, %v1821_v29 }
 0x2d0   : > { %v1082_v51 = vpop.f32.mrb[2].mxu0 }
 0x2d1   : > { %v1083_v19 = vadd.f32 %v1082_v51, %v863_v17  ;;  %v1084_v46 = vpop.f32.mrb[3].mxu0 }
 0x2d2   : > { %v1085_v52 = vadd.f32 %v1084_v46, %v867_v50 }
 0x2d3   : > { %v1115_v23 = vmul.f32 %v1815_v20, %v1083_v19 }
 0x2d4   : > { %v1116_v25 = vmul.f32 %v1817_v22, %v1085_v52 }
 0x2d5   : > { %v1117_v26 = vadd.f32 %v1115_v23, %v647_v21 }
 0x2d6   : > { %v1118_v27 = vadd.f32 %v1116_v25, %v648_v24 }
 0x2d7   : > { %1822 = vtanh.f32 %v1117_v26 }
 0x2d8   : > { %1824 = vtanh.f32 %v1118_v27 }
 0x2e1   : > { %v1823_v32 = vpop.eup %1822 }
 0x2e2   : > { %v1825_v33 = vpop.eup %1824  ;;  %v1123_v34 = vmul.f32 %v1823_v32, %v1121_v30 }
 0x2e3   : > { %v1124_v36 = vmul.f32 %v1825_v33, %v1122_v31 }
 0x2e4   : > { %v1127_v58 = vadd.f32 %v1125_v35, %v1123_v34  }
 0x2e5   : > { %v1128_v57 = vadd.f32 %v1126_v37, %v1124_v36  }
 0x2e6   : > { %v1135_v38 = vmul.f32 %v2184_v4, %v1127_v58 }
 0x2e7   : > { %1387 = vmatmul.mubr.f32.vlgmr.msra.gmra.mrb[2].mxu1 %v1128_v57 }
 0x2e8   : > { %1136 = vadd.xlane.f32.xlu0 %v1135_v38 }
 0x375   : > { %v1137_v42 = vpop.xlane.xlu0 %1136 }
 0x376   : > { %v1144_v43 = vadd.f32 %v1142_v40, %v1137_v42 }
 0x378   : > { %v1147_v59 = vsel %vm1146_vm1, %v1144_v43, %v1142_v40 }
 0x379   : > { %v1241_v61 = vmax.f32 %v2001_v55, %v1147_v59  }
 0x37b   : > { %v1242_v62 = vsub.f32 %v2001_v55, %v1241_v61  ;;  %v1245_v63 = vsub.f32 %v1147_v59, %v1241_v61  ;;  %v650_v55 = vld [vmem:[%s649_s14] sm:$0xff]  ;;  %v2456_v43 = vmov (%p628_p5), %v1241_v61 }
 0x37d   : > { %v1243_v0 = vmul.f32 1.442695, %v1242_v62  ;;  %v1246_v7 = vmul.f32 1.442695, %v1245_v63 }
 0x37f   : > { %1826 = vpow2.f32 %v1243_v0 }
 0x380   : > { %1828 = vpow2.f32 %v1246_v7 }
 0x389   : > { %v1827_v8 = vpop.eup %1826 }
 0x38a   : > { %v1829_v9 = vpop.eup %1828  ;;  %v1248_v10 = vmul.f32 %v1997_v54, %v1827_v8  ;;  %1252 = vperm.xlu0 %1804, %v1827_v8  }
 0x38b   : > { %1259 = vperm.xlu1 %1805, %v1829_v9  }
 0x38c   : > { %v1249_v11 = vadd.f32 %v1829_v9, %v1248_v10  }
 0x38e   : > { %v2452_v54 = vmov %v1249_v11  ;;  %v2455_v42 = vmov (%p628_p5), %v1249_v11 }
 0x3ba   : > { %v1236_v12 = vpop.f32.mrb[2].mxu1 }
 0x3bb   : > { %v1388_v13 = vpop.f32.mrb[3].mxu1  ;;  %v1237_v49 = vadd.f32 %v2194_v6, %v1236_v12 }
 0x3bd   : > { %1830 = vtanh.f32 %v1237_v49 }
 0x3c7   : > { %v1831_v14 = vpop.eup %1830 }
 0x3c8   : > { %v1256_v15 = vmul.f32 %v1831_v14, %v650_v55  ;;  %v2453_v55 = vmov %v1241_v61 }
 0x409   : > { %v1253_v16 = vpop.permute.xlu0 %1252  ;;  %631 = sbr.rel (!%p628_p5) target bundleno = 378 (0x17a), region = 89 }
 0x40a   : > { %v1260_v17 = vpop.permute.xlu1 %1259  ;;  %v1255_v18 = vmul.f32 %v1993_v53, %v1253_v16 }
 0x40b   : > { %v1262_v50 = vmul.f32 %v1260_v17, %v1256_v15 }
 0x40d   : > { %v1263_v51 = vadd.f32 %v1262_v50, %v1255_v18  }
 0x40f   : > { %v2451_v53 = vmov %v1263_v51  ;;  %v2454_v41 = vmov (%p628_p5), %v1263_v51 }
 0x410 PF:  { %v1271_v58 = vrot.slane %v2179_v3, %v2241_v45  ;;  %v2040_v19 = vmov 0   ;;  %v1264_v4 = vstv %s2439_s0  ;;  %s2041_s25 = smov [#allocation13]   ;;  %v2025_v43 = vphi %v2317_v43, %v2456_v43   ;;  %v2021_v42 = vphi %v2315_v42, %v2455_v42   ;;  %v2017_v41 = vphi %v2313_v41, %v2454_v41  }
 0x411   :  { %1832 = vset.pattern.permute.xlu0 %v2040_v19  ;;  %v1265_v5 = vsub.s32 8, %v1264_v4  ;;  %s1292_s26 = sshll.u32 %s2041_s25, 4  ;;  %s1293_s26 = int_to_ptr.vmem [resolvable:$true] %s1292_s26 }
 0x412   :  { %v1273_v46 = vsub.f32 %v1271_v58, %v2025_v43  ;;  %s1925_s8 = scalar_lea.vmem %s1293_s26, 128  ;;  %p1930_p7 = scmp.lt.s32.totalorder %s1293_s26, %s1293_s26 }
 0x413   :  { %v1266_v6 = vcvt.s32.f32 %v1265_v5  ;;  %p1926_p6 = scmp.ne.s32.totalorder %s1293_s26, %s1925_s8  ;;  %p1931_p8 = scmp.lt.s32.totalorder %s1925_s8, %s1925_s8 }
 0x414   :  { %v1274_v2 = vmul.f32 1.442695, %v1273_v46 }
 0x415   :  { %p1932_p9 = por %p1931_p8, %p1930_p7 }
 0x416   :  { %1833 = vpow2.f32 %v1274_v2 }
 0x417   :  { %p1933_p10 = pnand %p1932_p9, %p1926_p6 }
 0x420   :  { %v1834_v44 = vpop.eup %1833 }
 0x421   :  { %v1276_v47 = vmul.f32 %v1834_v44, %v1266_v6 }
 0x423   :  { %v1277_v48 = vadd.f32 %v2021_v42, %v1276_v47 }
 0x425   :  { %1835 = vrcp.f32 %v1277_v48 }
 0x42f   :  { %v1836_v1 = vpop.eup %1835 }
 0x430   :  { %1281 = vperm.xlu0 %1832, %v1836_v1  }
 0x4af   :  { %v1282_v3 = vpop.permute.xlu0 %1281 }
 0x4b0   :  { %v1284_v45 = vmul.f32 %v2017_v41, %v1282_v3 }
 0x4b2   :  { %1285 = vst [vmem:[#allocation13] sm:$0xff] %v1284_v45 }
 0x4b3   :  { %1936 = shalt.err (!%p1933_p10)
}
 0x4b4   :  { %s1937_s13 = scalar_lea.hbm %s2450_s11, 128 }
 0x4b5   :  { %p1938_p11 = scmp.ne.s32.totalorder %s2450_s11, %s1937_s13  ;;  %p1941_p12 = scmp.lt.u32.totalorder %s1937_s13, %s2450_s11 }
 0x4b7   :  { %p1943_p13 = pnand %p1941_p12, %p1938_p11 }
 0x4b9   :  { %1946 = shalt.err (!%p1943_p13)
}
 0x4ba   :  { %1295 = dma.vmem_to_hbm [thread:$0]  %s1293_s26, 128, %s2450_s11, [#allocation7]  }
 0x4bb   :  { %1989 = dma.done.wait [#allocation7], 128  }
 0x4bc   :  { %1990 = vsyncadd [#allocation7], 4294967168 }
 0x4bd   :  { %1299 = vsyncpa [#allocation6], 1 }
 0x4be   :  { %1300 = vsyncpa [#allocation9], 1 }
 0x4bf   :  { %1301 = vsyncpa [#allocation12], 1 }
 0x4c0   :  { %1302 = vsyncpa [#allocation7], 1 }

</bundles_post_ra>
